<compile_context>
chip_gen: v6e
topology: v6e:2x2x1
jax: 0.10.0
libtpu: 0.0.40
codegen_flags: <defaults>
</compile_context>

<pallas_src>
import jax
import jax.numpy as jnp
from jax.experimental import pallas as pl
from jax.experimental.pallas import tpu as pltpu

_MAX_LANES = 1024                    # widest lane-dense last dim we use
_SMALL_BYTES = 1 * 1024 * 1024       # below this, plain XLA clamp is cheaper


def _clamp(x):
    """Elementwise clamp to [-1, 1] with dtype-correct bounds (VPU only)."""
    one = jnp.asarray(1, dtype=x.dtype)
    y = jnp.minimum(x, one)
    if not jnp.issubdtype(x.dtype, jnp.unsignedinteger):
        # For unsigned dtypes the -1 bound never binds (and -one would wrap).
        y = jnp.maximum(y, -one)
    return y


def _crelu_kernel(x_ref, o_ref):
    o_ref[...] = _clamp(x_ref[...])


def _sublane_multiple(dtype) -> int:
    # Full-vreg sublane packing per dtype width.
    return {4: 8, 2: 16, 1: 32}.get(jnp.dtype(dtype).itemsize, 8)


def _round_up(a: int, b: int) -> int:
    return ((a + b - 1) // b) * b


def _cdiv(a: int, b: int) -> int:
    return -(-a // b)


def _hw_budget():
    """Generation-aware (block_bytes, vmem_limit_bytes)."""
    try:
        vmem_bytes = int(pltpu.get_tpu_info().vmem_capacity_bytes)
    except Exception:
        vmem_bytes = 64 * 1024 * 1024  # conservative (v7x-sized) fallback
    if vmem_bytes >= 96 * 1024 * 1024:     # v5e / v6e: 128 MiB VMEM
        block_bytes = 8 * 1024 * 1024
    else:                                   # v7x: 64 MiB per TensorCore
        block_bytes = 4 * 1024 * 1024
    # Double-buffered input + output = 4x block resident; leave ~1.5x slack.
    vmem_limit = min(vmem_bytes // 2, 6 * block_bytes)
    return block_bytes, vmem_limit


def _choose_lanes(total: int):
    """Largest lane-dense width that divides `total` exactly (no padding)."""
    for lanes in (1024, 512, 256, 128):
        if total % lanes == 0:
            return lanes
    return None


def _pick_tile_rows(rows: int, sublane: int, max_tile_rows: int) -> int:
    """Tile rows: VMEM-budget bound, sublane-aligned, even grid when possible."""
    max_tile_rows = max(sublane, (max_tile_rows // sublane) * sublane)
    tile_rows = min(max_tile_rows, _round_up(rows, sublane))
    steps = _cdiv(rows, tile_rows)
    if steps == 1 and rows > sublane:
        # Keep >= 2 steps so a parallel grid shards across both v7x cores.
        tile_rows = min(max_tile_rows, _round_up(_cdiv(rows, 2), sublane))
        steps = _cdiv(rows, tile_rows)
    if steps > 1 and steps % 2 == 1:
        # Nudge to an even step count so both TensorCores finish together.
        for cand in (steps + 1, steps + 3):
            tr = min(max_tile_rows, max(sublane, _round_up(_cdiv(rows, cand), sublane)))
            if _cdiv(rows, tr) % 2 == 0:
                return tr
    return tile_rows


def crelu(x, *, donate_input: bool = False):
    """torch.clamp(x, min=-1, max=1) — exact semantics, any shape/dtype."""
    orig_shape = x.shape
    dtype = x.dtype
    total = int(x.size)
    if total == 0:
        return x
    if dtype == jnp.bool_:
        # bool values {0, 1} already lie inside [-1, 1]; clamp is identity.
        return x

    itemsize = jnp.dtype(dtype).itemsize
    if total * itemsize < _SMALL_BYTES:
        # Launch + reshape plumbing would dominate; fused XLA clamp wins.
        return _clamp(x)

    # ---- Present the tensor as one lane-dense 2D slab, padding only if truly
    # ---- ragged (flat size not a multiple of 128), and only to 1024 elems.
    lanes = _choose_lanes(total)
    padded_total = total
    if lanes is None:
        lanes = _MAX_LANES
        padded_total = _round_up(total, lanes)

    xf = x.reshape(-1)
    if padded_total != total:
        # Clamping the zero padding is harmless; sliced off afterwards.
        xf = jnp.pad(xf, (0, padded_total - total))
    rows = padded_total // lanes
    x2d = xf.reshape(rows, lanes)

    block_bytes, vmem_limit = _hw_budget()
    sublane = _sublane_multiple(dtype)
    max_tile_rows = max(sublane, block_bytes // (lanes * itemsize))
    tile_rows = _pick_tile_rows(rows, sublane, max_tile_rows)

    out2d = pl.pallas_call(
        _crelu_kernel,
        out_shape=jax.ShapeDtypeStruct((rows, lanes), dtype),
        grid=(pl.cdiv(rows, tile_rows),),   # partial last block is masked
        in_specs=[pl.BlockSpec((tile_rows, lanes), lambda i: (i, 0))],
        out_specs=pl.BlockSpec((tile_rows, lanes), lambda i: (i, 0)),
        compiler_params=pltpu.CompilerParams(
            dimension_semantics=("parallel",),
            vmem_limit_bytes=vmem_limit,
        ),
        input_output_aliases=({0: 0} if donate_input else {}),
    )(x2d)

    outf = out2d.reshape(-1)
    if padded_total != total:
        outf = outf[:total]
    return outf.reshape(orig_shape)


if __name__ == "__main__":
    key = jax.random.PRNGKey(0)
    k0, k1, k2 = jax.random.split(key, 3)

    # Small NCHW input consistent with the module (batch=2, channels=4, 16x16).
    # This exercises the small-input fast path.
    x_small = jax.random.normal(k0, (2, 4, 16, 16), dtype=jnp.float32) * 3.0
    y_small = jax.block_until_ready(crelu(x_small))
    assert y_small.shape == x_small.shape and y_small.dtype == x_small.dtype
    assert bool(jnp.allclose(y_small, jnp.clip(x_small, -1.0, 1.0))), "small mismatch"

    # Larger, 1024-aligned input -> Pallas kernel, zero padding / zero slicing.
    x_big = jax.random.normal(k1, (4, 256, 1024), dtype=jnp.float32) * 3.0
    y_big = jax.block_until_ready(crelu(x_big))
    assert bool(jnp.allclose(y_big, jnp.clip(x_big, -1.0, 1.0))), "aligned mismatch"

    # Ragged size above the fast-path threshold -> Pallas kernel, padded path.
    x_rag = jax.random.normal(k2, (613, 517), dtype=jnp.float32) * 3.0
    y_rag = jax.block_until_ready(crelu(x_rag))
    assert bool(jnp.allclose(y_rag, jnp.clip(x_rag, -1.0, 1.0))), "ragged mismatch"

    print("KERNEL_OK")
</pallas_src>

<mosaic_0001>
module attributes {stable_mosaic.version = 11 : i64} {
  func.func @_crelu_kernel(%arg0: i32, %arg1: memref<512x1024xf32, #tpu.memory_space<vmem>>, %arg2: memref<512x1024xf32, #tpu.memory_space<vmem>>) attributes {dimension_semantics = [#tpu.dimension_semantics<parallel>], iteration_bounds = array<i64: 2>, scalar_prefetch = 0 : i64, scratch_operands = 0 : i64, tpu.core_type = #tpu.core_type<tc>, window_params = [{transform_indices = @transform_0, window_bounds = array<i64: 512, 1024>}, {transform_indices = @transform_1, window_bounds = array<i64: 512, 1024>}]} {
    %c0 = arith.constant 0 : index
    %c0_0 = arith.constant 0 : index
    %0 = vector.load %arg1[%c0, %c0_0] : memref<512x1024xf32, #tpu.memory_space<vmem>>, vector<512x1024xf32>
    %cst = arith.constant 1.000000e+00 : f32
    %1 = vector.broadcast %cst : f32 to vector<512x1024xf32>
    %2 = arith.minimumf %0, %1 : vector<512x1024xf32>
    %cst_1 = arith.constant 0.000000e+00 : f32
    %cst_2 = arith.constant 1.000000e+00 : f32
    %3 = arith.subf %cst_1, %cst_2 : f32
    %4 = vector.broadcast %3 : f32 to vector<512x1024xf32>
    %5 = arith.maximumf %2, %4 : vector<512x1024xf32>
    %c0_3 = arith.constant 0 : index
    %c0_4 = arith.constant 0 : index
    %6 = vector.load %arg2[%c0_3, %c0_4] : memref<512x1024xf32, #tpu.memory_space<vmem>>, vector<512x1024xf32>
    tpu.vector_store %arg2[%c0_3, %c0_4], %5 {strides = array<i32>} : memref<512x1024xf32, #tpu.memory_space<vmem>>, vector<512x1024xf32>,
    return
  }
  func.func @transform_0(%arg0: i32) -> (i32, i32) {
    %c0_i32 = arith.constant 0 : i32
    %c0_i32_0 = arith.constant 0 : i32
    return %arg0, %c0_i32 : i32, i32
  }
  func.func @transform_1(%arg0: i32) -> (i32, i32) {
    %c0_i32 = arith.constant 0 : i32
    %c0_i32_0 = arith.constant 0 : i32
    return %arg0, %c0_i32 : i32, i32
  }
}

</mosaic_0001>

<bundles_post_ra>
// kernel: tpu_custom_call.1
= control target key start
LH: loop header
LB: loop body
LE: loop exit
PB: predicated region body
PF: predicated region fallthrough
CT: control target
= control target key end

     0   :  { %6 = vsyncpa [#allocation3], 0  ;;  %s4149_s0 = inlined_call_operand.hbm [shape: f32[1024,1024], index: 0, kind: input, shape index: {}]   ;;  %s4150_s1 = inlined_call_operand.hbm [shape: f32[1024,1024], index: 1, kind: output, shape index: {}]  }
   0x1   :  { %8 = vsyncpa [#allocation3 + $0x1], 0 }
   0x2   :  { %9 = vsyncpa [#allocation4], 0 }
   0x3   :  { %11 = vsyncpa [#allocation4 + $0x1], 0  ;;  %s2966_s6 = smov 0   ;;  %s2968_s7 = smov 0  }
   0x4   :  { %s2970_s8 = smov 0   ;;  %s2972_s9 = smov 0  }
   0x5 LB: > { %s2987_s10 = sadd.s32 4294967295, %s2948_s9   ;;  %s2274_s11 = sadd.s32 4294967294, %s2948_s9   ;;  %s2948_s9 = sphi %s2972_s9, %s4165_s9   ;;  %s2944_s8 = sphi %s2970_s8, %s4164_s8   ;;  %s2940_s7 = sphi %s2968_s7, %s4163_s7   ;;  %s2936_s6 = sphi %s2966_s6, %s4162_s6  }
   0x6   : > { %s2991_s12 = sadd.s32 1, %s2948_s9   ;;  %s24_s13 = sadd.s32 1, %s2944_s8 }
   0x7   : > { %s21_s14 = ssub.s32 %s2948_s9, %s2991_s12  ;;  %p31_p0 = scmp.ne.s32.totalorder %s2944_s8, %s2940_s7 }
   0x8   : > { %p22_p1 = scmp.eq.s32.totalorder %s21_s14, 0  ;;  %p32_p2 = scmp.eq.s32.totalorder %s2948_s9, 0 }
   0x9   : > { %p37_p3 = scmp.ne.s32.totalorder %s2940_s7, %s2936_s6  ;;  %p38_p4 = scmp.eq.s32.totalorder %s2987_s10, 0 }
   0xa   : > { %s3003_s15 = scalar_select %p22_p1, %s2944_s8, %s24_s13  }
   0xb   : > { %p3005_p5 = por %p32_p2, %p31_p0  ;;  %p3009_p6 = por %p38_p4, %p37_p3 }
   0xc   : > { %p61_p7 = scmp.eq.s32.totalorder %s2987_s10, 1  ;;  %p67_p8 = scmp.eq.s32.totalorder %s2274_s11, 1 }
   0xd   : > { %s4154_s17 = scalar_select %p3009_p6, 1, 0 }
   0xe   : > { %p2818_p10 = scmp.lt.s32.totalorder %s2948_s9, 2  ;;  %p3016_p11 = por %p61_p7, %p31_p0 }
   0xf   : > { %p3020_p12 = por %p67_p8, %p37_p3  ;;  %s87_s20 = sand.u32 1, %s2944_s8  }
  0x10   : > { %s4155_s18 = scalar_select %p3016_p11, 1, 0 }
  0x11   : > { %s4156_s19 = scalar_select %p3020_p12, 1, 0 }
  0x12   : > { %s2803_s21 = sshll.u32 %s2948_s9, 16  ;;  %s2277_s22 = sshll.u32 %s87_s20, 12 }
  0x13   : > { %s3029_s25 = scalar_lea.hbm %s4149_s0, %s2803_s21  ;;  %s91_s26 = scalar_lea.vmem [#allocation2], %s2277_s22 }
  0x14   : > { %s99_s27 = sshll.u32 %s91_s26, 4  ;;  %p3033_p13 = pnand %p2818_p10, %p3005_p5  ;;  %s3037_s27 = int_to_ptr.vmem [resolvable:$true] %s99_s27 }
  0x15   : > { %s3039_s29 = scalar_lea.sflag [#allocation3], %s87_s20  ;;  %s2856_s30 = scalar_lea.hbm %s3029_s25, 65536 }
  0x16   : > { %p2857_p0 = scmp.ne.s32.totalorder %s3029_s25, %s2856_s30  ;;  %p2858_p1 = pneg %p3033_p13 }
  0x17   : > { %s2861_s4 = scalar_lea.hbm %s4149_s0, 131072  ;;  %p2862_p4 = scmp.lt.s32.totalorder %s3029_s25, %s4149_s0 }
  0x18   : > { %p2859_p2 = pnand %p2858_p1, %p2857_p0  ;;  %p2863_p5 = scmp.lt.s32.totalorder %s2861_s4, %s2856_s30 }
  0x1a   : > { %p2860_p3 = pneg %p2859_p2  ;;  %p2864_p7 = por %p2863_p5, %p2862_p4 }
  0x1c   : > { %p2865_p8 = pnand %p2864_p7, %p2860_p3 }
  0x1e   : > { %2868 = shalt.err (!%p2865_p8)
}
  0x1f   : > { %s2869_s13 = scalar_lea.vmem %s3037_s27, 65536  ;;  %s2950_s14 = smov [#allocation2]  }
  0x20   : > { %p2870_p10 = scmp.ne.s32.totalorder %s3037_s27, %s2869_s13  ;;  %s2874_s16 = sshll.u32 %s2950_s14, 4  ;;  %s2875_s16 = int_to_ptr.vmem [resolvable:$false] %s2874_s16 }
  0x21   : > { %s2876_s20 = scalar_lea.vmem %s2875_s16, 131072  ;;  %p2877_p2 = scmp.lt.s32.totalorder %s3037_s27, %s2875_s16 }
  0x22   : > { %p2872_p9 = pnand %p2870_p10, %p2858_p1  ;;  %p2878_p12 = scmp.lt.s32.totalorder %s2876_s20, %s2869_s13 }
  0x24   : > { %p2873_p0 = pneg %p2872_p9  ;;  %p2879_p11 = por %p2878_p12, %p2877_p2 }
  0x26   : > { %p2880_p6 = pnand %p2879_p11, %p2873_p0 }
  0x28   : > { %2883 = shalt.err (!%p2880_p6)
}
  0x29   : > { %s2951_s21 = smov 1024   ;;  %s2952_s22 = smov 64  }
  0x2a   : > { %2813 = dma.hbm_to_vmem [thread:$0]  (!%p3033_p13), %s3029_s25, 65536, %s3037_s27, %s3039_s29, %s2951_s21, %s2951_s21, %s2952_s22  }
  0x2b   : > { %p2281_p9 = scmp.ge.s32.totalorder %s2948_s9, 1  ;;  %p107_p1 = scmp.lt.s32.totalorder %s2948_s9, 3 }
  0x2d   : > { %p108_p3 = pnand %p2281_p9, %p107_p1 }
  0x2e   : > { %s3063_s23 = sand.u32 (!%p108_p3), 1, %s2940_s7   ;;  %p4158_p6 = scmp.ne.s32.totalorder (!%p108_p3), %s4154_s17, 0 }
  0x2f   : > { %111 = sbr.rel (%p108_p3) target bundleno = 332 (0x14c), region = 24  ;;  %s2282_s24 = sshll.u32 (!%p108_p3), %s3063_s23, 12 }
  0x30   : > { %s114_s26 = scalar_lea.sflag (!%p108_p3), [#allocation3], %s3063_s23  ;;  %s3067_s30 = scalar_lea.vmem (!%p108_p3), [#allocation2], %s2282_s24 }
  0x34   : > { %2927 = dma.done.wait (%p4158_p6), %s114_s26, 65536  }
  0x35   : > { %2929 = vsyncadd (%p4158_p6), %s114_s26, 4294901760  ;;  %v138_v0 = vld [vmem:[%s3067_s30] sm:$0xff]  ;;  %v139_v1 = vld [vmem:[%s3067_s30 + $0x8] sm:$0xff]  ;;  %s3082_s17 = scalar_lea.vmem [#allocation5], %s2282_s24  ;;  %s2805_s25 = sshll.u32 %s2987_s10, 16 }
  0x36   : > { %v140_v2 = vld [vmem:[%s3067_s30 + $0x10] sm:$0xff]  ;;  %v2284_v3 = vclamps-f32 %v138_v0, 1.0  ;;  %v2285_v4 = vclamps-f32 %v139_v1, 1.0  ;;  %v141_v6 = vld [vmem:[%s3067_s30 + $0x18] sm:$0xff]  ;;  %v142_v7 = vld [vmem:[%s3067_s30 + $0x20] sm:$0xff]  ;;  %s2201_s27 = sshll.u32 %s3082_s17, 4  ;;  %s4102_s2 = scalar_lea.hbm %s4150_s1, %s2805_s25  ;;  %s4104_s27 = int_to_ptr.vmem [resolvable:$true] %s2201_s27 }
  0x37   : > { %v2286_v5 = vclamps-f32 %v140_v2, 1.0  ;;  %v143_v8 = vld [vmem:[%s3067_s30 + $0x28] sm:$0xff]  ;;  %v2287_v9 = vclamps-f32 %v141_v6, 1.0  ;;  %v2288_v10 = vclamps-f32 %v142_v7, 1.0  ;;  %v144_v12 = vld [vmem:[%s3067_s30 + $0x30] sm:$0xff]  ;;  %v145_v13 = vld [vmem:[%s3067_s30 + $0x38] sm:$0xff] }
  0x38   : > { %v2289_v11 = vclamps-f32 %v143_v8, 1.0  ;;  %v146_v14 = vld [vmem:[%s3067_s30 + $0x40] sm:$0xff]  ;;  %1674 = vst [vmem:[%s3082_s17] sm:$0xff] %v2284_v3  ;;  %1675 = vst [vmem:[%s3082_s17 + $0x8] sm:$0xff] %v2285_v4  ;;  %v2290_v15 = vclamps-f32 %v144_v12, 1.0  ;;  %v2291_v16 = vclamps-f32 %v145_v13, 1.0  ;;  %v147_v18 = vld [vmem:[%s3067_s30 + $0x48] sm:$0xff] }
  0x39   : > { %1676 = vst [vmem:[%s3082_s17 + $0x10] sm:$0xff] %v2286_v5  ;;  %v2292_v17 = vclamps-f32 %v146_v14, 1.0  ;;  %v148_v19 = vld [vmem:[%s3067_s30 + $0x50] sm:$0xff]  ;;  %v149_v20 = vld [vmem:[%s3067_s30 + $0x58] sm:$0xff]  ;;  %1677 = vst [vmem:[%s3082_s17 + $0x18] sm:$0xff] %v2287_v9  ;;  %v2293_v21 = vclamps-f32 %v147_v18, 1.0 }
  0x3a   : > { %1678 = vst [vmem:[%s3082_s17 + $0x20] sm:$0xff] %v2288_v10  ;;  %1679 = vst [vmem:[%s3082_s17 + $0x28] sm:$0xff] %v2289_v11  ;;  %v2294_v22 = vclamps-f32 %v148_v19, 1.0  ;;  %v2295_v23 = vclamps-f32 %v149_v20, 1.0  ;;  %v150_v24 = vld [vmem:[%s3067_s30 + $0x60] sm:$0xff]  ;;  %v151_v25 = vld [vmem:[%s3067_s30 + $0x68] sm:$0xff] }
  0x3b   : > { %v152_v26 = vld [vmem:[%s3067_s30 + $0x70] sm:$0xff]  ;;  %1680 = vst [vmem:[%s3082_s17 + $0x30] sm:$0xff] %v2290_v15  ;;  %1681 = vst [vmem:[%s3082_s17 + $0x38] sm:$0xff] %v2291_v16  ;;  %v2296_v27 = vclamps-f32 %v150_v24, 1.0  ;;  %v2297_v28 = vclamps-f32 %v151_v25, 1.0  ;;  %v153_v30 = vld [vmem:[%s3067_s30 + $0x78] sm:$0xff] }
  0x3c   : > { %1682 = vst [vmem:[%s3082_s17 + $0x40] sm:$0xff] %v2292_v17  ;;  %v2298_v29 = vclamps-f32 %v152_v26, 1.0  ;;  %v154_v31 = vld [vmem:[%s3067_s30 + $0x80] sm:$0xff]  ;;  %v155_v32 = vld [vmem:[%s3067_s30 + $0x88] sm:$0xff]  ;;  %1683 = vst [vmem:[%s3082_s17 + $0x48] sm:$0xff] %v2293_v21  ;;  %v2299_v33 = vclamps-f32 %v153_v30, 1.0 }
  0x3d   : > { %1684 = vst [vmem:[%s3082_s17 + $0x50] sm:$0xff] %v2294_v22  ;;  %1685 = vst [vmem:[%s3082_s17 + $0x58] sm:$0xff] %v2295_v23  ;;  %v2300_v34 = vclamps-f32 %v154_v31, 1.0  ;;  %v2301_v35 = vclamps-f32 %v155_v32, 1.0  ;;  %v156_v36 = vld [vmem:[%s3067_s30 + $0x90] sm:$0xff]  ;;  %v157_v37 = vld [vmem:[%s3067_s30 + $0x98] sm:$0xff] }
  0x3e   : > { %v158_v38 = vld [vmem:[%s3067_s30 + $0xa0] sm:$0xff]  ;;  %1686 = vst [vmem:[%s3082_s17 + $0x60] sm:$0xff] %v2296_v27  ;;  %1687 = vst [vmem:[%s3082_s17 + $0x68] sm:$0xff] %v2297_v28  ;;  %v2302_v39 = vclamps-f32 %v156_v36, 1.0  ;;  %v2303_v40 = vclamps-f32 %v157_v37, 1.0  ;;  %v159_v42 = vld [vmem:[%s3067_s30 + $0xa8] sm:$0xff] }
  0x3f   : > { %1688 = vst [vmem:[%s3082_s17 + $0x70] sm:$0xff] %v2298_v29  ;;  %v2304_v41 = vclamps-f32 %v158_v38, 1.0  ;;  %v160_v43 = vld [vmem:[%s3067_s30 + $0xb0] sm:$0xff]  ;;  %v161_v44 = vld [vmem:[%s3067_s30 + $0xb8] sm:$0xff]  ;;  %1689 = vst [vmem:[%s3082_s17 + $0x78] sm:$0xff] %v2299_v33  ;;  %v2305_v45 = vclamps-f32 %v159_v42, 1.0 }
  0x40   : > { %1690 = vst [vmem:[%s3082_s17 + $0x80] sm:$0xff] %v2300_v34  ;;  %1691 = vst [vmem:[%s3082_s17 + $0x88] sm:$0xff] %v2301_v35  ;;  %v2306_v46 = vclamps-f32 %v160_v43, 1.0  ;;  %v2307_v47 = vclamps-f32 %v161_v44, 1.0  ;;  %v162_v48 = vld [vmem:[%s3067_s30 + $0xc0] sm:$0xff]  ;;  %v163_v49 = vld [vmem:[%s3067_s30 + $0xc8] sm:$0xff] }
  0x41   : > { %v164_v50 = vld [vmem:[%s3067_s30 + $0xd0] sm:$0xff]  ;;  %1692 = vst [vmem:[%s3082_s17 + $0x90] sm:$0xff] %v2302_v39  ;;  %1693 = vst [vmem:[%s3082_s17 + $0x98] sm:$0xff] %v2303_v40  ;;  %v2308_v51 = vclamps-f32 %v162_v48, 1.0  ;;  %v2309_v52 = vclamps-f32 %v163_v49, 1.0  ;;  %v165_v54 = vld [vmem:[%s3067_s30 + $0xd8] sm:$0xff] }
  0x42   : > { %1694 = vst [vmem:[%s3082_s17 + $0xa0] sm:$0xff] %v2304_v41  ;;  %v2310_v53 = vclamps-f32 %v164_v50, 1.0  ;;  %v166_v55 = vld [vmem:[%s3067_s30 + $0xe0] sm:$0xff]  ;;  %v167_v56 = vld [vmem:[%s3067_s30 + $0xe8] sm:$0xff]  ;;  %1695 = vst [vmem:[%s3082_s17 + $0xa8] sm:$0xff] %v2305_v45  ;;  %v2311_v57 = vclamps-f32 %v165_v54, 1.0 }
  0x43   : > { %1696 = vst [vmem:[%s3082_s17 + $0xb0] sm:$0xff] %v2306_v46  ;;  %1697 = vst [vmem:[%s3082_s17 + $0xb8] sm:$0xff] %v2307_v47  ;;  %v2312_v58 = vclamps-f32 %v166_v55, 1.0  ;;  %v2313_v59 = vclamps-f32 %v167_v56, 1.0  ;;  %v168_v60 = vld [vmem:[%s3067_s30 + $0xf0] sm:$0xff]  ;;  %v169_v61 = vld [vmem:[%s3067_s30 + $0xf8] sm:$0xff] }
  0x44   : > { %v170_v62 = vld [vmem:[%s3067_s30 + $0x100] sm:$0xff]  ;;  %1698 = vst [vmem:[%s3082_s17 + $0xc0] sm:$0xff] %v2308_v51  ;;  %1699 = vst [vmem:[%s3082_s17 + $0xc8] sm:$0xff] %v2309_v52  ;;  %v2314_v63 = vclamps-f32 %v168_v60, 1.0  ;;  %v2315_v0 = vclamps-f32 %v169_v61, 1.0  ;;  %v171_v2 = vld [vmem:[%s3067_s30 + $0x108] sm:$0xff] }
  0x45   : > { %1700 = vst [vmem:[%s3082_s17 + $0xd0] sm:$0xff] %v2310_v53  ;;  %v2316_v1 = vclamps-f32 %v170_v62, 1.0  ;;  %v172_v3 = vld [vmem:[%s3067_s30 + $0x110] sm:$0xff]  ;;  %v173_v4 = vld [vmem:[%s3067_s30 + $0x118] sm:$0xff]  ;;  %1701 = vst [vmem:[%s3082_s17 + $0xd8] sm:$0xff] %v2311_v57  ;;  %v2317_v5 = vclamps-f32 %v171_v2, 1.0 }
  0x46   : > { %1702 = vst [vmem:[%s3082_s17 + $0xe0] sm:$0xff] %v2312_v58  ;;  %1703 = vst [vmem:[%s3082_s17 + $0xe8] sm:$0xff] %v2313_v59  ;;  %v2318_v6 = vclamps-f32 %v172_v3, 1.0  ;;  %v2319_v7 = vclamps-f32 %v173_v4, 1.0  ;;  %v174_v8 = vld [vmem:[%s3067_s30 + $0x120] sm:$0xff]  ;;  %v175_v9 = vld [vmem:[%s3067_s30 + $0x128] sm:$0xff] }
  0x47   : > { %v176_v10 = vld [vmem:[%s3067_s30 + $0x130] sm:$0xff]  ;;  %1704 = vst [vmem:[%s3082_s17 + $0xf0] sm:$0xff] %v2314_v63  ;;  %1705 = vst [vmem:[%s3082_s17 + $0xf8] sm:$0xff] %v2315_v0  ;;  %v2320_v11 = vclamps-f32 %v174_v8, 1.0  ;;  %v2321_v12 = vclamps-f32 %v175_v9, 1.0  ;;  %v177_v14 = vld [vmem:[%s3067_s30 + $0x138] sm:$0xff] }
  0x48   : > { %1706 = vst [vmem:[%s3082_s17 + $0x100] sm:$0xff] %v2316_v1  ;;  %v2322_v13 = vclamps-f32 %v176_v10, 1.0  ;;  %v178_v15 = vld [vmem:[%s3067_s30 + $0x140] sm:$0xff]  ;;  %v179_v16 = vld [vmem:[%s3067_s30 + $0x148] sm:$0xff]  ;;  %1707 = vst [vmem:[%s3082_s17 + $0x108] sm:$0xff] %v2317_v5  ;;  %v2323_v17 = vclamps-f32 %v177_v14, 1.0 }
  0x49   : > { %1708 = vst [vmem:[%s3082_s17 + $0x110] sm:$0xff] %v2318_v6  ;;  %1709 = vst [vmem:[%s3082_s17 + $0x118] sm:$0xff] %v2319_v7  ;;  %v2324_v18 = vclamps-f32 %v178_v15, 1.0  ;;  %v2325_v19 = vclamps-f32 %v179_v16, 1.0  ;;  %v180_v20 = vld [vmem:[%s3067_s30 + $0x150] sm:$0xff]  ;;  %v181_v21 = vld [vmem:[%s3067_s30 + $0x158] sm:$0xff] }
  0x4a   : > { %v182_v22 = vld [vmem:[%s3067_s30 + $0x160] sm:$0xff]  ;;  %1710 = vst [vmem:[%s3082_s17 + $0x120] sm:$0xff] %v2320_v11  ;;  %1711 = vst [vmem:[%s3082_s17 + $0x128] sm:$0xff] %v2321_v12  ;;  %v2326_v23 = vclamps-f32 %v180_v20, 1.0  ;;  %v2327_v24 = vclamps-f32 %v181_v21, 1.0  ;;  %v183_v26 = vld [vmem:[%s3067_s30 + $0x168] sm:$0xff] }
  0x4b   : > { %1712 = vst [vmem:[%s3082_s17 + $0x130] sm:$0xff] %v2322_v13  ;;  %v2328_v25 = vclamps-f32 %v182_v22, 1.0  ;;  %v184_v27 = vld [vmem:[%s3067_s30 + $0x170] sm:$0xff]  ;;  %v185_v28 = vld [vmem:[%s3067_s30 + $0x178] sm:$0xff]  ;;  %1713 = vst [vmem:[%s3082_s17 + $0x138] sm:$0xff] %v2323_v17  ;;  %v2329_v29 = vclamps-f32 %v183_v26, 1.0 }
  0x4c   : > { %1714 = vst [vmem:[%s3082_s17 + $0x140] sm:$0xff] %v2324_v18  ;;  %1715 = vst [vmem:[%s3082_s17 + $0x148] sm:$0xff] %v2325_v19  ;;  %v2330_v30 = vclamps-f32 %v184_v27, 1.0  ;;  %v2331_v31 = vclamps-f32 %v185_v28, 1.0  ;;  %v186_v32 = vld [vmem:[%s3067_s30 + $0x180] sm:$0xff]  ;;  %v187_v33 = vld [vmem:[%s3067_s30 + $0x188] sm:$0xff] }
  0x4d   : > { %v188_v34 = vld [vmem:[%s3067_s30 + $0x190] sm:$0xff]  ;;  %1716 = vst [vmem:[%s3082_s17 + $0x150] sm:$0xff] %v2326_v23  ;;  %1717 = vst [vmem:[%s3082_s17 + $0x158] sm:$0xff] %v2327_v24  ;;  %v2332_v35 = vclamps-f32 %v186_v32, 1.0  ;;  %v2333_v36 = vclamps-f32 %v187_v33, 1.0  ;;  %v189_v38 = vld [vmem:[%s3067_s30 + $0x198] sm:$0xff] }
  0x4e   : > { %1718 = vst [vmem:[%s3082_s17 + $0x160] sm:$0xff] %v2328_v25  ;;  %v2334_v37 = vclamps-f32 %v188_v34, 1.0  ;;  %v190_v39 = vld [vmem:[%s3067_s30 + $0x1a0] sm:$0xff]  ;;  %v191_v40 = vld [vmem:[%s3067_s30 + $0x1a8] sm:$0xff]  ;;  %1719 = vst [vmem:[%s3082_s17 + $0x168] sm:$0xff] %v2329_v29  ;;  %v2335_v41 = vclamps-f32 %v189_v38, 1.0 }
  0x4f   : > { %1720 = vst [vmem:[%s3082_s17 + $0x170] sm:$0xff] %v2330_v30  ;;  %1721 = vst [vmem:[%s3082_s17 + $0x178] sm:$0xff] %v2331_v31  ;;  %v2336_v42 = vclamps-f32 %v190_v39, 1.0  ;;  %v2337_v43 = vclamps-f32 %v191_v40, 1.0  ;;  %v192_v44 = vld [vmem:[%s3067_s30 + $0x1b0] sm:$0xff]  ;;  %v193_v45 = vld [vmem:[%s3067_s30 + $0x1b8] sm:$0xff] }
  0x50   : > { %v194_v46 = vld [vmem:[%s3067_s30 + $0x1c0] sm:$0xff]  ;;  %1722 = vst [vmem:[%s3082_s17 + $0x180] sm:$0xff] %v2332_v35  ;;  %1723 = vst [vmem:[%s3082_s17 + $0x188] sm:$0xff] %v2333_v36  ;;  %v2338_v47 = vclamps-f32 %v192_v44, 1.0  ;;  %v2339_v48 = vclamps-f32 %v193_v45, 1.0  ;;  %v195_v50 = vld [vmem:[%s3067_s30 + $0x1c8] sm:$0xff] }
  0x51   : > { %1724 = vst [vmem:[%s3082_s17 + $0x190] sm:$0xff] %v2334_v37  ;;  %v2340_v49 = vclamps-f32 %v194_v46, 1.0  ;;  %v196_v51 = vld [vmem:[%s3067_s30 + $0x1d0] sm:$0xff]  ;;  %v197_v52 = vld [vmem:[%s3067_s30 + $0x1d8] sm:$0xff]  ;;  %1725 = vst [vmem:[%s3082_s17 + $0x198] sm:$0xff] %v2335_v41  ;;  %v2341_v53 = vclamps-f32 %v195_v50, 1.0 }
  0x52   : > { %1726 = vst [vmem:[%s3082_s17 + $0x1a0] sm:$0xff] %v2336_v42  ;;  %1727 = vst [vmem:[%s3082_s17 + $0x1a8] sm:$0xff] %v2337_v43  ;;  %v2342_v54 = vclamps-f32 %v196_v51, 1.0  ;;  %v2343_v55 = vclamps-f32 %v197_v52, 1.0  ;;  %v198_v56 = vld [vmem:[%s3067_s30 + $0x1e0] sm:$0xff]  ;;  %v199_v57 = vld [vmem:[%s3067_s30 + $0x1e8] sm:$0xff] }
  0x53   : > { %v200_v58 = vld [vmem:[%s3067_s30 + $0x1f0] sm:$0xff]  ;;  %1728 = vst [vmem:[%s3082_s17 + $0x1b0] sm:$0xff] %v2338_v47  ;;  %1729 = vst [vmem:[%s3082_s17 + $0x1b8] sm:$0xff] %v2339_v48  ;;  %v2344_v59 = vclamps-f32 %v198_v56, 1.0  ;;  %v2345_v60 = vclamps-f32 %v199_v57, 1.0  ;;  %v201_v62 = vld [vmem:[%s3067_s30 + $0x1f8] sm:$0xff] }
  0x54   : > { %1730 = vst [vmem:[%s3082_s17 + $0x1c0] sm:$0xff] %v2340_v49  ;;  %v2346_v61 = vclamps-f32 %v200_v58, 1.0  ;;  %v202_v63 = vld [vmem:[%s3067_s30 + $0x200] sm:$0xff]  ;;  %v203_v0 = vld [vmem:[%s3067_s30 + $0x208] sm:$0xff]  ;;  %1731 = vst [vmem:[%s3082_s17 + $0x1c8] sm:$0xff] %v2341_v53  ;;  %v2347_v1 = vclamps-f32 %v201_v62, 1.0 }
  0x55   : > { %1732 = vst [vmem:[%s3082_s17 + $0x1d0] sm:$0xff] %v2342_v54  ;;  %1733 = vst [vmem:[%s3082_s17 + $0x1d8] sm:$0xff] %v2343_v55  ;;  %v2348_v2 = vclamps-f32 %v202_v63, 1.0  ;;  %v2349_v3 = vclamps-f32 %v203_v0, 1.0  ;;  %v204_v4 = vld [vmem:[%s3067_s30 + $0x210] sm:$0xff]  ;;  %v205_v5 = vld [vmem:[%s3067_s30 + $0x218] sm:$0xff] }
  0x56   : > { %v206_v6 = vld [vmem:[%s3067_s30 + $0x220] sm:$0xff]  ;;  %1734 = vst [vmem:[%s3082_s17 + $0x1e0] sm:$0xff] %v2344_v59  ;;  %1735 = vst [vmem:[%s3082_s17 + $0x1e8] sm:$0xff] %v2345_v60  ;;  %v2350_v7 = vclamps-f32 %v204_v4, 1.0  ;;  %v2351_v8 = vclamps-f32 %v205_v5, 1.0  ;;  %v207_v10 = vld [vmem:[%s3067_s30 + $0x228] sm:$0xff] }
  0x57   : > { %1736 = vst [vmem:[%s3082_s17 + $0x1f0] sm:$0xff] %v2346_v61  ;;  %v2352_v9 = vclamps-f32 %v206_v6, 1.0  ;;  %v208_v11 = vld [vmem:[%s3067_s30 + $0x230] sm:$0xff]  ;;  %v209_v12 = vld [vmem:[%s3067_s30 + $0x238] sm:$0xff]  ;;  %1737 = vst [vmem:[%s3082_s17 + $0x1f8] sm:$0xff] %v2347_v1  ;;  %v2353_v13 = vclamps-f32 %v207_v10, 1.0 }
  0x58   : > { %1738 = vst [vmem:[%s3082_s17 + $0x200] sm:$0xff] %v2348_v2  ;;  %1739 = vst [vmem:[%s3082_s17 + $0x208] sm:$0xff] %v2349_v3  ;;  %v2354_v14 = vclamps-f32 %v208_v11, 1.0  ;;  %v2355_v15 = vclamps-f32 %v209_v12, 1.0  ;;  %v210_v16 = vld [vmem:[%s3067_s30 + $0x240] sm:$0xff]  ;;  %v211_v17 = vld [vmem:[%s3067_s30 + $0x248] sm:$0xff] }
  0x59   : > { %v212_v18 = vld [vmem:[%s3067_s30 + $0x250] sm:$0xff]  ;;  %1740 = vst [vmem:[%s3082_s17 + $0x210] sm:$0xff] %v2350_v7  ;;  %1741 = vst [vmem:[%s3082_s17 + $0x218] sm:$0xff] %v2351_v8  ;;  %v2356_v19 = vclamps-f32 %v210_v16, 1.0  ;;  %v2357_v20 = vclamps-f32 %v211_v17, 1.0  ;;  %v213_v22 = vld [vmem:[%s3067_s30 + $0x258] sm:$0xff] }
  0x5a   : > { %1742 = vst [vmem:[%s3082_s17 + $0x220] sm:$0xff] %v2352_v9  ;;  %v2358_v21 = vclamps-f32 %v212_v18, 1.0  ;;  %v214_v23 = vld [vmem:[%s3067_s30 + $0x260] sm:$0xff]  ;;  %v215_v24 = vld [vmem:[%s3067_s30 + $0x268] sm:$0xff]  ;;  %1743 = vst [vmem:[%s3082_s17 + $0x228] sm:$0xff] %v2353_v13  ;;  %v2359_v25 = vclamps-f32 %v213_v22, 1.0 }
  0x5b   : > { %1744 = vst [vmem:[%s3082_s17 + $0x230] sm:$0xff] %v2354_v14  ;;  %1745 = vst [vmem:[%s3082_s17 + $0x238] sm:$0xff] %v2355_v15  ;;  %v2360_v26 = vclamps-f32 %v214_v23, 1.0  ;;  %v2361_v27 = vclamps-f32 %v215_v24, 1.0  ;;  %v216_v28 = vld [vmem:[%s3067_s30 + $0x270] sm:$0xff]  ;;  %v217_v29 = vld [vmem:[%s3067_s30 + $0x278] sm:$0xff] }
  0x5c   : > { %v218_v30 = vld [vmem:[%s3067_s30 + $0x280] sm:$0xff]  ;;  %1746 = vst [vmem:[%s3082_s17 + $0x240] sm:$0xff] %v2356_v19  ;;  %1747 = vst [vmem:[%s3082_s17 + $0x248] sm:$0xff] %v2357_v20  ;;  %v2362_v31 = vclamps-f32 %v216_v28, 1.0  ;;  %v2363_v32 = vclamps-f32 %v217_v29, 1.0  ;;  %v219_v34 = vld [vmem:[%s3067_s30 + $0x288] sm:$0xff] }
  0x5d   : > { %1748 = vst [vmem:[%s3082_s17 + $0x250] sm:$0xff] %v2358_v21  ;;  %v2364_v33 = vclamps-f32 %v218_v30, 1.0  ;;  %v220_v35 = vld [vmem:[%s3067_s30 + $0x290] sm:$0xff]  ;;  %v221_v36 = vld [vmem:[%s3067_s30 + $0x298] sm:$0xff]  ;;  %1749 = vst [vmem:[%s3082_s17 + $0x258] sm:$0xff] %v2359_v25  ;;  %v2365_v37 = vclamps-f32 %v219_v34, 1.0 }
  0x5e   : > { %1750 = vst [vmem:[%s3082_s17 + $0x260] sm:$0xff] %v2360_v26  ;;  %1751 = vst [vmem:[%s3082_s17 + $0x268] sm:$0xff] %v2361_v27  ;;  %v2366_v38 = vclamps-f32 %v220_v35, 1.0  ;;  %v2367_v39 = vclamps-f32 %v221_v36, 1.0  ;;  %v222_v40 = vld [vmem:[%s3067_s30 + $0x2a0] sm:$0xff]  ;;  %v223_v41 = vld [vmem:[%s3067_s30 + $0x2a8] sm:$0xff] }
  0x5f   : > { %v224_v42 = vld [vmem:[%s3067_s30 + $0x2b0] sm:$0xff]  ;;  %1752 = vst [vmem:[%s3082_s17 + $0x270] sm:$0xff] %v2362_v31  ;;  %1753 = vst [vmem:[%s3082_s17 + $0x278] sm:$0xff] %v2363_v32  ;;  %v2368_v43 = vclamps-f32 %v222_v40, 1.0  ;;  %v2369_v44 = vclamps-f32 %v223_v41, 1.0  ;;  %v225_v46 = vld [vmem:[%s3067_s30 + $0x2b8] sm:$0xff] }
  0x60   : > { %1754 = vst [vmem:[%s3082_s17 + $0x280] sm:$0xff] %v2364_v33  ;;  %v2370_v45 = vclamps-f32 %v224_v42, 1.0  ;;  %v226_v47 = vld [vmem:[%s3067_s30 + $0x2c0] sm:$0xff]  ;;  %v227_v48 = vld [vmem:[%s3067_s30 + $0x2c8] sm:$0xff]  ;;  %1755 = vst [vmem:[%s3082_s17 + $0x288] sm:$0xff] %v2365_v37  ;;  %v2371_v49 = vclamps-f32 %v225_v46, 1.0 }
  0x61   : > { %1756 = vst [vmem:[%s3082_s17 + $0x290] sm:$0xff] %v2366_v38  ;;  %1757 = vst [vmem:[%s3082_s17 + $0x298] sm:$0xff] %v2367_v39  ;;  %v2372_v50 = vclamps-f32 %v226_v47, 1.0  ;;  %v2373_v51 = vclamps-f32 %v227_v48, 1.0  ;;  %v228_v52 = vld [vmem:[%s3067_s30 + $0x2d0] sm:$0xff]  ;;  %v229_v53 = vld [vmem:[%s3067_s30 + $0x2d8] sm:$0xff] }
  0x62   : > { %v230_v54 = vld [vmem:[%s3067_s30 + $0x2e0] sm:$0xff]  ;;  %1758 = vst [vmem:[%s3082_s17 + $0x2a0] sm:$0xff] %v2368_v43  ;;  %1759 = vst [vmem:[%s3082_s17 + $0x2a8] sm:$0xff] %v2369_v44  ;;  %v2374_v55 = vclamps-f32 %v228_v52, 1.0  ;;  %v2375_v56 = vclamps-f32 %v229_v53, 1.0  ;;  %v231_v58 = vld [vmem:[%s3067_s30 + $0x2e8] sm:$0xff] }
  0x63   : > { %1760 = vst [vmem:[%s3082_s17 + $0x2b0] sm:$0xff] %v2370_v45  ;;  %v2376_v57 = vclamps-f32 %v230_v54, 1.0  ;;  %v232_v59 = vld [vmem:[%s3067_s30 + $0x2f0] sm:$0xff]  ;;  %v233_v60 = vld [vmem:[%s3067_s30 + $0x2f8] sm:$0xff]  ;;  %1761 = vst [vmem:[%s3082_s17 + $0x2b8] sm:$0xff] %v2371_v49  ;;  %v2377_v61 = vclamps-f32 %v231_v58, 1.0 }
  0x64   : > { %1762 = vst [vmem:[%s3082_s17 + $0x2c0] sm:$0xff] %v2372_v50  ;;  %1763 = vst [vmem:[%s3082_s17 + $0x2c8] sm:$0xff] %v2373_v51  ;;  %v2378_v62 = vclamps-f32 %v232_v59, 1.0  ;;  %v2379_v63 = vclamps-f32 %v233_v60, 1.0  ;;  %v234_v0 = vld [vmem:[%s3067_s30 + $0x300] sm:$0xff]  ;;  %v235_v1 = vld [vmem:[%s3067_s30 + $0x308] sm:$0xff] }
  0x65   : > { %v236_v2 = vld [vmem:[%s3067_s30 + $0x310] sm:$0xff]  ;;  %1764 = vst [vmem:[%s3082_s17 + $0x2d0] sm:$0xff] %v2374_v55  ;;  %1765 = vst [vmem:[%s3082_s17 + $0x2d8] sm:$0xff] %v2375_v56  ;;  %v2380_v3 = vclamps-f32 %v234_v0, 1.0  ;;  %v2381_v4 = vclamps-f32 %v235_v1, 1.0  ;;  %v237_v6 = vld [vmem:[%s3067_s30 + $0x318] sm:$0xff] }
  0x66   : > { %1766 = vst [vmem:[%s3082_s17 + $0x2e0] sm:$0xff] %v2376_v57  ;;  %v2382_v5 = vclamps-f32 %v236_v2, 1.0  ;;  %v238_v7 = vld [vmem:[%s3067_s30 + $0x320] sm:$0xff]  ;;  %v239_v8 = vld [vmem:[%s3067_s30 + $0x328] sm:$0xff]  ;;  %1767 = vst [vmem:[%s3082_s17 + $0x2e8] sm:$0xff] %v2377_v61  ;;  %v2383_v9 = vclamps-f32 %v237_v6, 1.0 }
  0x67   : > { %1768 = vst [vmem:[%s3082_s17 + $0x2f0] sm:$0xff] %v2378_v62  ;;  %1769 = vst [vmem:[%s3082_s17 + $0x2f8] sm:$0xff] %v2379_v63  ;;  %v2384_v10 = vclamps-f32 %v238_v7, 1.0  ;;  %v2385_v11 = vclamps-f32 %v239_v8, 1.0  ;;  %v240_v12 = vld [vmem:[%s3067_s30 + $0x330] sm:$0xff]  ;;  %v241_v13 = vld [vmem:[%s3067_s30 + $0x338] sm:$0xff] }
  0x68   : > { %v242_v14 = vld [vmem:[%s3067_s30 + $0x340] sm:$0xff]  ;;  %1770 = vst [vmem:[%s3082_s17 + $0x300] sm:$0xff] %v2380_v3  ;;  %1771 = vst [vmem:[%s3082_s17 + $0x308] sm:$0xff] %v2381_v4  ;;  %v2386_v15 = vclamps-f32 %v240_v12, 1.0  ;;  %v2387_v16 = vclamps-f32 %v241_v13, 1.0  ;;  %v243_v18 = vld [vmem:[%s3067_s30 + $0x348] sm:$0xff] }
  0x69   : > { %1772 = vst [vmem:[%s3082_s17 + $0x310] sm:$0xff] %v2382_v5  ;;  %v2388_v17 = vclamps-f32 %v242_v14, 1.0  ;;  %v244_v19 = vld [vmem:[%s3067_s30 + $0x350] sm:$0xff]  ;;  %v245_v20 = vld [vmem:[%s3067_s30 + $0x358] sm:$0xff]  ;;  %1773 = vst [vmem:[%s3082_s17 + $0x318] sm:$0xff] %v2383_v9  ;;  %v2389_v21 = vclamps-f32 %v243_v18, 1.0 }
  0x6a   : > { %1774 = vst [vmem:[%s3082_s17 + $0x320] sm:$0xff] %v2384_v10  ;;  %1775 = vst [vmem:[%s3082_s17 + $0x328] sm:$0xff] %v2385_v11  ;;  %v2390_v22 = vclamps-f32 %v244_v19, 1.0  ;;  %v2391_v23 = vclamps-f32 %v245_v20, 1.0  ;;  %v246_v24 = vld [vmem:[%s3067_s30 + $0x360] sm:$0xff]  ;;  %v247_v25 = vld [vmem:[%s3067_s30 + $0x368] sm:$0xff] }
  0x6b   : > { %v248_v26 = vld [vmem:[%s3067_s30 + $0x370] sm:$0xff]  ;;  %1776 = vst [vmem:[%s3082_s17 + $0x330] sm:$0xff] %v2386_v15  ;;  %1777 = vst [vmem:[%s3082_s17 + $0x338] sm:$0xff] %v2387_v16  ;;  %v2392_v27 = vclamps-f32 %v246_v24, 1.0  ;;  %v2393_v28 = vclamps-f32 %v247_v25, 1.0  ;;  %v249_v30 = vld [vmem:[%s3067_s30 + $0x378] sm:$0xff] }
  0x6c   : > { %1778 = vst [vmem:[%s3082_s17 + $0x340] sm:$0xff] %v2388_v17  ;;  %v2394_v29 = vclamps-f32 %v248_v26, 1.0  ;;  %v250_v31 = vld [vmem:[%s3067_s30 + $0x380] sm:$0xff]  ;;  %v251_v32 = vld [vmem:[%s3067_s30 + $0x388] sm:$0xff]  ;;  %1779 = vst [vmem:[%s3082_s17 + $0x348] sm:$0xff] %v2389_v21  ;;  %v2395_v33 = vclamps-f32 %v249_v30, 1.0 }
  0x6d   : > { %1780 = vst [vmem:[%s3082_s17 + $0x350] sm:$0xff] %v2390_v22  ;;  %1781 = vst [vmem:[%s3082_s17 + $0x358] sm:$0xff] %v2391_v23  ;;  %v2396_v34 = vclamps-f32 %v250_v31, 1.0  ;;  %v2397_v35 = vclamps-f32 %v251_v32, 1.0  ;;  %v252_v36 = vld [vmem:[%s3067_s30 + $0x390] sm:$0xff]  ;;  %v253_v37 = vld [vmem:[%s3067_s30 + $0x398] sm:$0xff] }
  0x6e   : > { %v254_v38 = vld [vmem:[%s3067_s30 + $0x3a0] sm:$0xff]  ;;  %1782 = vst [vmem:[%s3082_s17 + $0x360] sm:$0xff] %v2392_v27  ;;  %1783 = vst [vmem:[%s3082_s17 + $0x368] sm:$0xff] %v2393_v28  ;;  %v2398_v39 = vclamps-f32 %v252_v36, 1.0  ;;  %v2399_v40 = vclamps-f32 %v253_v37, 1.0  ;;  %v255_v42 = vld [vmem:[%s3067_s30 + $0x3a8] sm:$0xff] }
  0x6f   : > { %1784 = vst [vmem:[%s3082_s17 + $0x370] sm:$0xff] %v2394_v29  ;;  %v2400_v41 = vclamps-f32 %v254_v38, 1.0  ;;  %v256_v43 = vld [vmem:[%s3067_s30 + $0x3b0] sm:$0xff]  ;;  %v257_v44 = vld [vmem:[%s3067_s30 + $0x3b8] sm:$0xff]  ;;  %1785 = vst [vmem:[%s3082_s17 + $0x378] sm:$0xff] %v2395_v33  ;;  %v2401_v45 = vclamps-f32 %v255_v42, 1.0 }
  0x70   : > { %1786 = vst [vmem:[%s3082_s17 + $0x380] sm:$0xff] %v2396_v34  ;;  %1787 = vst [vmem:[%s3082_s17 + $0x388] sm:$0xff] %v2397_v35  ;;  %v2402_v46 = vclamps-f32 %v256_v43, 1.0  ;;  %v2403_v47 = vclamps-f32 %v257_v44, 1.0  ;;  %v258_v48 = vld [vmem:[%s3067_s30 + $0x3c0] sm:$0xff]  ;;  %v259_v49 = vld [vmem:[%s3067_s30 + $0x3c8] sm:$0xff] }
  0x71   : > { %v260_v50 = vld [vmem:[%s3067_s30 + $0x3d0] sm:$0xff]  ;;  %1788 = vst [vmem:[%s3082_s17 + $0x390] sm:$0xff] %v2398_v39  ;;  %1789 = vst [vmem:[%s3082_s17 + $0x398] sm:$0xff] %v2399_v40  ;;  %v2404_v51 = vclamps-f32 %v258_v48, 1.0  ;;  %v2405_v52 = vclamps-f32 %v259_v49, 1.0  ;;  %v261_v54 = vld [vmem:[%s3067_s30 + $0x3d8] sm:$0xff] }
  0x72   : > { %1790 = vst [vmem:[%s3082_s17 + $0x3a0] sm:$0xff] %v2400_v41  ;;  %v2406_v53 = vclamps-f32 %v260_v50, 1.0  ;;  %v262_v55 = vld [vmem:[%s3067_s30 + $0x3e0] sm:$0xff]  ;;  %v263_v56 = vld [vmem:[%s3067_s30 + $0x3e8] sm:$0xff]  ;;  %1791 = vst [vmem:[%s3082_s17 + $0x3a8] sm:$0xff] %v2401_v45  ;;  %v2407_v57 = vclamps-f32 %v261_v54, 1.0 }
  0x73   : > { %1792 = vst [vmem:[%s3082_s17 + $0x3b0] sm:$0xff] %v2402_v46  ;;  %1793 = vst [vmem:[%s3082_s17 + $0x3b8] sm:$0xff] %v2403_v47  ;;  %v2408_v58 = vclamps-f32 %v262_v55, 1.0  ;;  %v2409_v59 = vclamps-f32 %v263_v56, 1.0  ;;  %v264_v60 = vld [vmem:[%s3067_s30 + $0x3f0] sm:$0xff]  ;;  %v265_v61 = vld [vmem:[%s3067_s30 + $0x3f8] sm:$0xff] }
  0x74   : > { %v266_v62 = vld [vmem:[%s3067_s30 + $0x400] sm:$0xff]  ;;  %1794 = vst [vmem:[%s3082_s17 + $0x3c0] sm:$0xff] %v2404_v51  ;;  %1795 = vst [vmem:[%s3082_s17 + $0x3c8] sm:$0xff] %v2405_v52  ;;  %v2410_v63 = vclamps-f32 %v264_v60, 1.0  ;;  %v2411_v0 = vclamps-f32 %v265_v61, 1.0  ;;  %v267_v2 = vld [vmem:[%s3067_s30 + $0x408] sm:$0xff] }
  0x75   : > { %1796 = vst [vmem:[%s3082_s17 + $0x3d0] sm:$0xff] %v2406_v53  ;;  %v2412_v1 = vclamps-f32 %v266_v62, 1.0  ;;  %v268_v3 = vld [vmem:[%s3067_s30 + $0x410] sm:$0xff]  ;;  %v269_v4 = vld [vmem:[%s3067_s30 + $0x418] sm:$0xff]  ;;  %1797 = vst [vmem:[%s3082_s17 + $0x3d8] sm:$0xff] %v2407_v57  ;;  %v2413_v5 = vclamps-f32 %v267_v2, 1.0 }
  0x76   : > { %1798 = vst [vmem:[%s3082_s17 + $0x3e0] sm:$0xff] %v2408_v58  ;;  %1799 = vst [vmem:[%s3082_s17 + $0x3e8] sm:$0xff] %v2409_v59  ;;  %v2414_v6 = vclamps-f32 %v268_v3, 1.0  ;;  %v2415_v7 = vclamps-f32 %v269_v4, 1.0  ;;  %v270_v8 = vld [vmem:[%s3067_s30 + $0x420] sm:$0xff]  ;;  %v271_v9 = vld [vmem:[%s3067_s30 + $0x428] sm:$0xff] }
  0x77   : > { %v272_v10 = vld [vmem:[%s3067_s30 + $0x430] sm:$0xff]  ;;  %1800 = vst [vmem:[%s3082_s17 + $0x3f0] sm:$0xff] %v2410_v63  ;;  %1801 = vst [vmem:[%s3082_s17 + $0x3f8] sm:$0xff] %v2411_v0  ;;  %v2416_v11 = vclamps-f32 %v270_v8, 1.0  ;;  %v2417_v12 = vclamps-f32 %v271_v9, 1.0  ;;  %v273_v14 = vld [vmem:[%s3067_s30 + $0x438] sm:$0xff] }
  0x78   : > { %1802 = vst [vmem:[%s3082_s17 + $0x400] sm:$0xff] %v2412_v1  ;;  %v2418_v13 = vclamps-f32 %v272_v10, 1.0  ;;  %v274_v15 = vld [vmem:[%s3067_s30 + $0x440] sm:$0xff]  ;;  %v275_v16 = vld [vmem:[%s3067_s30 + $0x448] sm:$0xff]  ;;  %1803 = vst [vmem:[%s3082_s17 + $0x408] sm:$0xff] %v2413_v5  ;;  %v2419_v17 = vclamps-f32 %v273_v14, 1.0 }
  0x79   : > { %1804 = vst [vmem:[%s3082_s17 + $0x410] sm:$0xff] %v2414_v6  ;;  %1805 = vst [vmem:[%s3082_s17 + $0x418] sm:$0xff] %v2415_v7  ;;  %v2420_v18 = vclamps-f32 %v274_v15, 1.0  ;;  %v2421_v19 = vclamps-f32 %v275_v16, 1.0  ;;  %v276_v20 = vld [vmem:[%s3067_s30 + $0x450] sm:$0xff]  ;;  %v277_v21 = vld [vmem:[%s3067_s30 + $0x458] sm:$0xff] }
  0x7a   : > { %v278_v22 = vld [vmem:[%s3067_s30 + $0x460] sm:$0xff]  ;;  %1806 = vst [vmem:[%s3082_s17 + $0x420] sm:$0xff] %v2416_v11  ;;  %1807 = vst [vmem:[%s3082_s17 + $0x428] sm:$0xff] %v2417_v12  ;;  %v2422_v23 = vclamps-f32 %v276_v20, 1.0  ;;  %v2423_v24 = vclamps-f32 %v277_v21, 1.0  ;;  %v279_v26 = vld [vmem:[%s3067_s30 + $0x468] sm:$0xff] }
  0x7b   : > { %1808 = vst [vmem:[%s3082_s17 + $0x430] sm:$0xff] %v2418_v13  ;;  %v2424_v25 = vclamps-f32 %v278_v22, 1.0  ;;  %v280_v27 = vld [vmem:[%s3067_s30 + $0x470] sm:$0xff]  ;;  %v281_v28 = vld [vmem:[%s3067_s30 + $0x478] sm:$0xff]  ;;  %1809 = vst [vmem:[%s3082_s17 + $0x438] sm:$0xff] %v2419_v17  ;;  %v2425_v29 = vclamps-f32 %v279_v26, 1.0 }
  0x7c   : > { %1810 = vst [vmem:[%s3082_s17 + $0x440] sm:$0xff] %v2420_v18  ;;  %1811 = vst [vmem:[%s3082_s17 + $0x448] sm:$0xff] %v2421_v19  ;;  %v2426_v30 = vclamps-f32 %v280_v27, 1.0  ;;  %v2427_v31 = vclamps-f32 %v281_v28, 1.0  ;;  %v282_v32 = vld [vmem:[%s3067_s30 + $0x480] sm:$0xff]  ;;  %v283_v33 = vld [vmem:[%s3067_s30 + $0x488] sm:$0xff] }
  0x7d   : > { %v284_v34 = vld [vmem:[%s3067_s30 + $0x490] sm:$0xff]  ;;  %1812 = vst [vmem:[%s3082_s17 + $0x450] sm:$0xff] %v2422_v23  ;;  %1813 = vst [vmem:[%s3082_s17 + $0x458] sm:$0xff] %v2423_v24  ;;  %v2428_v35 = vclamps-f32 %v282_v32, 1.0  ;;  %v2429_v36 = vclamps-f32 %v283_v33, 1.0  ;;  %v285_v38 = vld [vmem:[%s3067_s30 + $0x498] sm:$0xff] }
  0x7e   : > { %1814 = vst [vmem:[%s3082_s17 + $0x460] sm:$0xff] %v2424_v25  ;;  %v2430_v37 = vclamps-f32 %v284_v34, 1.0  ;;  %v286_v39 = vld [vmem:[%s3067_s30 + $0x4a0] sm:$0xff]  ;;  %v287_v40 = vld [vmem:[%s3067_s30 + $0x4a8] sm:$0xff]  ;;  %1815 = vst [vmem:[%s3082_s17 + $0x468] sm:$0xff] %v2425_v29  ;;  %v2431_v41 = vclamps-f32 %v285_v38, 1.0 }
  0x7f   : > { %1816 = vst [vmem:[%s3082_s17 + $0x470] sm:$0xff] %v2426_v30  ;;  %1817 = vst [vmem:[%s3082_s17 + $0x478] sm:$0xff] %v2427_v31  ;;  %v2432_v42 = vclamps-f32 %v286_v39, 1.0  ;;  %v2433_v43 = vclamps-f32 %v287_v40, 1.0  ;;  %v288_v44 = vld [vmem:[%s3067_s30 + $0x4b0] sm:$0xff]  ;;  %v289_v45 = vld [vmem:[%s3067_s30 + $0x4b8] sm:$0xff] }
  0x80   : > { %v290_v46 = vld [vmem:[%s3067_s30 + $0x4c0] sm:$0xff]  ;;  %1818 = vst [vmem:[%s3082_s17 + $0x480] sm:$0xff] %v2428_v35  ;;  %1819 = vst [vmem:[%s3082_s17 + $0x488] sm:$0xff] %v2429_v36  ;;  %v2434_v47 = vclamps-f32 %v288_v44, 1.0  ;;  %v2435_v48 = vclamps-f32 %v289_v45, 1.0  ;;  %v291_v50 = vld [vmem:[%s3067_s30 + $0x4c8] sm:$0xff] }
  0x81   : > { %1820 = vst [vmem:[%s3082_s17 + $0x490] sm:$0xff] %v2430_v37  ;;  %v2436_v49 = vclamps-f32 %v290_v46, 1.0  ;;  %v292_v51 = vld [vmem:[%s3067_s30 + $0x4d0] sm:$0xff]  ;;  %v293_v52 = vld [vmem:[%s3067_s30 + $0x4d8] sm:$0xff]  ;;  %1821 = vst [vmem:[%s3082_s17 + $0x498] sm:$0xff] %v2431_v41  ;;  %v2437_v53 = vclamps-f32 %v291_v50, 1.0 }
  0x82   : > { %1822 = vst [vmem:[%s3082_s17 + $0x4a0] sm:$0xff] %v2432_v42  ;;  %1823 = vst [vmem:[%s3082_s17 + $0x4a8] sm:$0xff] %v2433_v43  ;;  %v2438_v54 = vclamps-f32 %v292_v51, 1.0  ;;  %v2439_v55 = vclamps-f32 %v293_v52, 1.0  ;;  %v294_v56 = vld [vmem:[%s3067_s30 + $0x4e0] sm:$0xff]  ;;  %v295_v57 = vld [vmem:[%s3067_s30 + $0x4e8] sm:$0xff] }
  0x83   : > { %v296_v58 = vld [vmem:[%s3067_s30 + $0x4f0] sm:$0xff]  ;;  %1824 = vst [vmem:[%s3082_s17 + $0x4b0] sm:$0xff] %v2434_v47  ;;  %1825 = vst [vmem:[%s3082_s17 + $0x4b8] sm:$0xff] %v2435_v48  ;;  %v2440_v59 = vclamps-f32 %v294_v56, 1.0  ;;  %v2441_v60 = vclamps-f32 %v295_v57, 1.0  ;;  %v297_v62 = vld [vmem:[%s3067_s30 + $0x4f8] sm:$0xff] }
  0x84   : > { %1826 = vst [vmem:[%s3082_s17 + $0x4c0] sm:$0xff] %v2436_v49  ;;  %v2442_v61 = vclamps-f32 %v296_v58, 1.0  ;;  %v298_v63 = vld [vmem:[%s3067_s30 + $0x500] sm:$0xff]  ;;  %v299_v0 = vld [vmem:[%s3067_s30 + $0x508] sm:$0xff]  ;;  %1827 = vst [vmem:[%s3082_s17 + $0x4c8] sm:$0xff] %v2437_v53  ;;  %v2443_v1 = vclamps-f32 %v297_v62, 1.0 }
  0x85   : > { %1828 = vst [vmem:[%s3082_s17 + $0x4d0] sm:$0xff] %v2438_v54  ;;  %1829 = vst [vmem:[%s3082_s17 + $0x4d8] sm:$0xff] %v2439_v55  ;;  %v2444_v2 = vclamps-f32 %v298_v63, 1.0  ;;  %v2445_v3 = vclamps-f32 %v299_v0, 1.0  ;;  %v300_v4 = vld [vmem:[%s3067_s30 + $0x510] sm:$0xff]  ;;  %v301_v5 = vld [vmem:[%s3067_s30 + $0x518] sm:$0xff] }
  0x86   : > { %v302_v6 = vld [vmem:[%s3067_s30 + $0x520] sm:$0xff]  ;;  %1830 = vst [vmem:[%s3082_s17 + $0x4e0] sm:$0xff] %v2440_v59  ;;  %1831 = vst [vmem:[%s3082_s17 + $0x4e8] sm:$0xff] %v2441_v60  ;;  %v2446_v7 = vclamps-f32 %v300_v4, 1.0  ;;  %v2447_v8 = vclamps-f32 %v301_v5, 1.0  ;;  %v303_v10 = vld [vmem:[%s3067_s30 + $0x528] sm:$0xff] }
  0x87   : > { %1832 = vst [vmem:[%s3082_s17 + $0x4f0] sm:$0xff] %v2442_v61  ;;  %v2448_v9 = vclamps-f32 %v302_v6, 1.0  ;;  %v304_v11 = vld [vmem:[%s3067_s30 + $0x530] sm:$0xff]  ;;  %v305_v12 = vld [vmem:[%s3067_s30 + $0x538] sm:$0xff]  ;;  %1833 = vst [vmem:[%s3082_s17 + $0x4f8] sm:$0xff] %v2443_v1  ;;  %v2449_v13 = vclamps-f32 %v303_v10, 1.0 }
  0x88   : > { %1834 = vst [vmem:[%s3082_s17 + $0x500] sm:$0xff] %v2444_v2  ;;  %1835 = vst [vmem:[%s3082_s17 + $0x508] sm:$0xff] %v2445_v3  ;;  %v2450_v14 = vclamps-f32 %v304_v11, 1.0  ;;  %v2451_v15 = vclamps-f32 %v305_v12, 1.0  ;;  %v306_v16 = vld [vmem:[%s3067_s30 + $0x540] sm:$0xff]  ;;  %v307_v17 = vld [vmem:[%s3067_s30 + $0x548] sm:$0xff] }
  0x89   : > { %v308_v18 = vld [vmem:[%s3067_s30 + $0x550] sm:$0xff]  ;;  %1836 = vst [vmem:[%s3082_s17 + $0x510] sm:$0xff] %v2446_v7  ;;  %1837 = vst [vmem:[%s3082_s17 + $0x518] sm:$0xff] %v2447_v8  ;;  %v2452_v19 = vclamps-f32 %v306_v16, 1.0  ;;  %v2453_v20 = vclamps-f32 %v307_v17, 1.0  ;;  %v309_v22 = vld [vmem:[%s3067_s30 + $0x558] sm:$0xff] }
  0x8a   : > { %1838 = vst [vmem:[%s3082_s17 + $0x520] sm:$0xff] %v2448_v9  ;;  %v2454_v21 = vclamps-f32 %v308_v18, 1.0  ;;  %v310_v23 = vld [vmem:[%s3067_s30 + $0x560] sm:$0xff]  ;;  %v311_v24 = vld [vmem:[%s3067_s30 + $0x568] sm:$0xff]  ;;  %1839 = vst [vmem:[%s3082_s17 + $0x528] sm:$0xff] %v2449_v13  ;;  %v2455_v25 = vclamps-f32 %v309_v22, 1.0 }
  0x8b   : > { %1840 = vst [vmem:[%s3082_s17 + $0x530] sm:$0xff] %v2450_v14  ;;  %1841 = vst [vmem:[%s3082_s17 + $0x538] sm:$0xff] %v2451_v15  ;;  %v2456_v26 = vclamps-f32 %v310_v23, 1.0  ;;  %v2457_v27 = vclamps-f32 %v311_v24, 1.0  ;;  %v312_v28 = vld [vmem:[%s3067_s30 + $0x570] sm:$0xff]  ;;  %v313_v29 = vld [vmem:[%s3067_s30 + $0x578] sm:$0xff] }
  0x8c   : > { %v314_v30 = vld [vmem:[%s3067_s30 + $0x580] sm:$0xff]  ;;  %1842 = vst [vmem:[%s3082_s17 + $0x540] sm:$0xff] %v2452_v19  ;;  %1843 = vst [vmem:[%s3082_s17 + $0x548] sm:$0xff] %v2453_v20  ;;  %v2458_v31 = vclamps-f32 %v312_v28, 1.0  ;;  %v2459_v32 = vclamps-f32 %v313_v29, 1.0  ;;  %v315_v34 = vld [vmem:[%s3067_s30 + $0x588] sm:$0xff] }
  0x8d   : > { %1844 = vst [vmem:[%s3082_s17 + $0x550] sm:$0xff] %v2454_v21  ;;  %v2460_v33 = vclamps-f32 %v314_v30, 1.0  ;;  %v316_v35 = vld [vmem:[%s3067_s30 + $0x590] sm:$0xff]  ;;  %v317_v36 = vld [vmem:[%s3067_s30 + $0x598] sm:$0xff]  ;;  %1845 = vst [vmem:[%s3082_s17 + $0x558] sm:$0xff] %v2455_v25  ;;  %v2461_v37 = vclamps-f32 %v315_v34, 1.0 }
  0x8e   : > { %1846 = vst [vmem:[%s3082_s17 + $0x560] sm:$0xff] %v2456_v26  ;;  %1847 = vst [vmem:[%s3082_s17 + $0x568] sm:$0xff] %v2457_v27  ;;  %v2462_v38 = vclamps-f32 %v316_v35, 1.0  ;;  %v2463_v39 = vclamps-f32 %v317_v36, 1.0  ;;  %v318_v40 = vld [vmem:[%s3067_s30 + $0x5a0] sm:$0xff]  ;;  %v319_v41 = vld [vmem:[%s3067_s30 + $0x5a8] sm:$0xff] }
  0x8f   : > { %v320_v42 = vld [vmem:[%s3067_s30 + $0x5b0] sm:$0xff]  ;;  %1848 = vst [vmem:[%s3082_s17 + $0x570] sm:$0xff] %v2458_v31  ;;  %1849 = vst [vmem:[%s3082_s17 + $0x578] sm:$0xff] %v2459_v32  ;;  %v2464_v43 = vclamps-f32 %v318_v40, 1.0  ;;  %v2465_v44 = vclamps-f32 %v319_v41, 1.0  ;;  %v321_v46 = vld [vmem:[%s3067_s30 + $0x5b8] sm:$0xff] }
  0x90   : > { %1850 = vst [vmem:[%s3082_s17 + $0x580] sm:$0xff] %v2460_v33  ;;  %v2466_v45 = vclamps-f32 %v320_v42, 1.0  ;;  %v322_v47 = vld [vmem:[%s3067_s30 + $0x5c0] sm:$0xff]  ;;  %v323_v48 = vld [vmem:[%s3067_s30 + $0x5c8] sm:$0xff]  ;;  %1851 = vst [vmem:[%s3082_s17 + $0x588] sm:$0xff] %v2461_v37  ;;  %v2467_v49 = vclamps-f32 %v321_v46, 1.0 }
  0x91   : > { %1852 = vst [vmem:[%s3082_s17 + $0x590] sm:$0xff] %v2462_v38  ;;  %1853 = vst [vmem:[%s3082_s17 + $0x598] sm:$0xff] %v2463_v39  ;;  %v2468_v50 = vclamps-f32 %v322_v47, 1.0  ;;  %v2469_v51 = vclamps-f32 %v323_v48, 1.0  ;;  %v324_v52 = vld [vmem:[%s3067_s30 + $0x5d0] sm:$0xff]  ;;  %v325_v53 = vld [vmem:[%s3067_s30 + $0x5d8] sm:$0xff] }
  0x92   : > { %v326_v54 = vld [vmem:[%s3067_s30 + $0x5e0] sm:$0xff]  ;;  %1854 = vst [vmem:[%s3082_s17 + $0x5a0] sm:$0xff] %v2464_v43  ;;  %1855 = vst [vmem:[%s3082_s17 + $0x5a8] sm:$0xff] %v2465_v44  ;;  %v2470_v55 = vclamps-f32 %v324_v52, 1.0  ;;  %v2471_v56 = vclamps-f32 %v325_v53, 1.0  ;;  %v327_v58 = vld [vmem:[%s3067_s30 + $0x5e8] sm:$0xff] }
  0x93   : > { %1856 = vst [vmem:[%s3082_s17 + $0x5b0] sm:$0xff] %v2466_v45  ;;  %v2472_v57 = vclamps-f32 %v326_v54, 1.0  ;;  %v328_v59 = vld [vmem:[%s3067_s30 + $0x5f0] sm:$0xff]  ;;  %v329_v60 = vld [vmem:[%s3067_s30 + $0x5f8] sm:$0xff]  ;;  %1857 = vst [vmem:[%s3082_s17 + $0x5b8] sm:$0xff] %v2467_v49  ;;  %v2473_v61 = vclamps-f32 %v327_v58, 1.0 }
  0x94   : > { %1858 = vst [vmem:[%s3082_s17 + $0x5c0] sm:$0xff] %v2468_v50  ;;  %1859 = vst [vmem:[%s3082_s17 + $0x5c8] sm:$0xff] %v2469_v51  ;;  %v2474_v62 = vclamps-f32 %v328_v59, 1.0  ;;  %v2475_v63 = vclamps-f32 %v329_v60, 1.0  ;;  %v330_v0 = vld [vmem:[%s3067_s30 + $0x600] sm:$0xff]  ;;  %v331_v1 = vld [vmem:[%s3067_s30 + $0x608] sm:$0xff] }
  0x95   : > { %v332_v2 = vld [vmem:[%s3067_s30 + $0x610] sm:$0xff]  ;;  %1860 = vst [vmem:[%s3082_s17 + $0x5d0] sm:$0xff] %v2470_v55  ;;  %1861 = vst [vmem:[%s3082_s17 + $0x5d8] sm:$0xff] %v2471_v56  ;;  %v2476_v3 = vclamps-f32 %v330_v0, 1.0  ;;  %v2477_v4 = vclamps-f32 %v331_v1, 1.0  ;;  %v333_v6 = vld [vmem:[%s3067_s30 + $0x618] sm:$0xff] }
  0x96   : > { %1862 = vst [vmem:[%s3082_s17 + $0x5e0] sm:$0xff] %v2472_v57  ;;  %v2478_v5 = vclamps-f32 %v332_v2, 1.0  ;;  %v334_v7 = vld [vmem:[%s3067_s30 + $0x620] sm:$0xff]  ;;  %v335_v8 = vld [vmem:[%s3067_s30 + $0x628] sm:$0xff]  ;;  %1863 = vst [vmem:[%s3082_s17 + $0x5e8] sm:$0xff] %v2473_v61  ;;  %v2479_v9 = vclamps-f32 %v333_v6, 1.0 }
  0x97   : > { %1864 = vst [vmem:[%s3082_s17 + $0x5f0] sm:$0xff] %v2474_v62  ;;  %1865 = vst [vmem:[%s3082_s17 + $0x5f8] sm:$0xff] %v2475_v63  ;;  %v2480_v10 = vclamps-f32 %v334_v7, 1.0  ;;  %v2481_v11 = vclamps-f32 %v335_v8, 1.0  ;;  %v336_v12 = vld [vmem:[%s3067_s30 + $0x630] sm:$0xff]  ;;  %v337_v13 = vld [vmem:[%s3067_s30 + $0x638] sm:$0xff] }
  0x98   : > { %v338_v14 = vld [vmem:[%s3067_s30 + $0x640] sm:$0xff]  ;;  %1866 = vst [vmem:[%s3082_s17 + $0x600] sm:$0xff] %v2476_v3  ;;  %1867 = vst [vmem:[%s3082_s17 + $0x608] sm:$0xff] %v2477_v4  ;;  %v2482_v15 = vclamps-f32 %v336_v12, 1.0  ;;  %v2483_v16 = vclamps-f32 %v337_v13, 1.0  ;;  %v339_v18 = vld [vmem:[%s3067_s30 + $0x648] sm:$0xff] }
  0x99   : > { %1868 = vst [vmem:[%s3082_s17 + $0x610] sm:$0xff] %v2478_v5  ;;  %v2484_v17 = vclamps-f32 %v338_v14, 1.0  ;;  %v340_v19 = vld [vmem:[%s3067_s30 + $0x650] sm:$0xff]  ;;  %v341_v20 = vld [vmem:[%s3067_s30 + $0x658] sm:$0xff]  ;;  %1869 = vst [vmem:[%s3082_s17 + $0x618] sm:$0xff] %v2479_v9  ;;  %v2485_v21 = vclamps-f32 %v339_v18, 1.0 }
  0x9a   : > { %1870 = vst [vmem:[%s3082_s17 + $0x620] sm:$0xff] %v2480_v10  ;;  %1871 = vst [vmem:[%s3082_s17 + $0x628] sm:$0xff] %v2481_v11  ;;  %v2486_v22 = vclamps-f32 %v340_v19, 1.0  ;;  %v2487_v23 = vclamps-f32 %v341_v20, 1.0  ;;  %v342_v24 = vld [vmem:[%s3067_s30 + $0x660] sm:$0xff]  ;;  %v343_v25 = vld [vmem:[%s3067_s30 + $0x668] sm:$0xff] }
  0x9b   : > { %v344_v26 = vld [vmem:[%s3067_s30 + $0x670] sm:$0xff]  ;;  %1872 = vst [vmem:[%s3082_s17 + $0x630] sm:$0xff] %v2482_v15  ;;  %1873 = vst [vmem:[%s3082_s17 + $0x638] sm:$0xff] %v2483_v16  ;;  %v2488_v27 = vclamps-f32 %v342_v24, 1.0  ;;  %v2489_v28 = vclamps-f32 %v343_v25, 1.0  ;;  %v345_v30 = vld [vmem:[%s3067_s30 + $0x678] sm:$0xff] }
  0x9c   : > { %1874 = vst [vmem:[%s3082_s17 + $0x640] sm:$0xff] %v2484_v17  ;;  %v2490_v29 = vclamps-f32 %v344_v26, 1.0  ;;  %v346_v31 = vld [vmem:[%s3067_s30 + $0x680] sm:$0xff]  ;;  %v347_v32 = vld [vmem:[%s3067_s30 + $0x688] sm:$0xff]  ;;  %1875 = vst [vmem:[%s3082_s17 + $0x648] sm:$0xff] %v2485_v21  ;;  %v2491_v33 = vclamps-f32 %v345_v30, 1.0 }
  0x9d   : > { %1876 = vst [vmem:[%s3082_s17 + $0x650] sm:$0xff] %v2486_v22  ;;  %1877 = vst [vmem:[%s3082_s17 + $0x658] sm:$0xff] %v2487_v23  ;;  %v2492_v34 = vclamps-f32 %v346_v31, 1.0  ;;  %v2493_v35 = vclamps-f32 %v347_v32, 1.0  ;;  %v348_v36 = vld [vmem:[%s3067_s30 + $0x690] sm:$0xff]  ;;  %v349_v37 = vld [vmem:[%s3067_s30 + $0x698] sm:$0xff] }
  0x9e   : > { %v350_v38 = vld [vmem:[%s3067_s30 + $0x6a0] sm:$0xff]  ;;  %1878 = vst [vmem:[%s3082_s17 + $0x660] sm:$0xff] %v2488_v27  ;;  %1879 = vst [vmem:[%s3082_s17 + $0x668] sm:$0xff] %v2489_v28  ;;  %v2494_v39 = vclamps-f32 %v348_v36, 1.0  ;;  %v2495_v40 = vclamps-f32 %v349_v37, 1.0  ;;  %v351_v42 = vld [vmem:[%s3067_s30 + $0x6a8] sm:$0xff] }
  0x9f   : > { %1880 = vst [vmem:[%s3082_s17 + $0x670] sm:$0xff] %v2490_v29  ;;  %v2496_v41 = vclamps-f32 %v350_v38, 1.0  ;;  %v352_v43 = vld [vmem:[%s3067_s30 + $0x6b0] sm:$0xff]  ;;  %v353_v44 = vld [vmem:[%s3067_s30 + $0x6b8] sm:$0xff]  ;;  %1881 = vst [vmem:[%s3082_s17 + $0x678] sm:$0xff] %v2491_v33  ;;  %v2497_v45 = vclamps-f32 %v351_v42, 1.0 }
  0xa0   : > { %1882 = vst [vmem:[%s3082_s17 + $0x680] sm:$0xff] %v2492_v34  ;;  %1883 = vst [vmem:[%s3082_s17 + $0x688] sm:$0xff] %v2493_v35  ;;  %v2498_v46 = vclamps-f32 %v352_v43, 1.0  ;;  %v2499_v47 = vclamps-f32 %v353_v44, 1.0  ;;  %v354_v48 = vld [vmem:[%s3067_s30 + $0x6c0] sm:$0xff]  ;;  %v355_v49 = vld [vmem:[%s3067_s30 + $0x6c8] sm:$0xff] }
  0xa1   : > { %v356_v50 = vld [vmem:[%s3067_s30 + $0x6d0] sm:$0xff]  ;;  %1884 = vst [vmem:[%s3082_s17 + $0x690] sm:$0xff] %v2494_v39  ;;  %1885 = vst [vmem:[%s3082_s17 + $0x698] sm:$0xff] %v2495_v40  ;;  %v2500_v51 = vclamps-f32 %v354_v48, 1.0  ;;  %v2501_v52 = vclamps-f32 %v355_v49, 1.0  ;;  %v357_v54 = vld [vmem:[%s3067_s30 + $0x6d8] sm:$0xff] }
  0xa2   : > { %1886 = vst [vmem:[%s3082_s17 + $0x6a0] sm:$0xff] %v2496_v41  ;;  %v2502_v53 = vclamps-f32 %v356_v50, 1.0  ;;  %v358_v55 = vld [vmem:[%s3067_s30 + $0x6e0] sm:$0xff]  ;;  %v359_v56 = vld [vmem:[%s3067_s30 + $0x6e8] sm:$0xff]  ;;  %1887 = vst [vmem:[%s3082_s17 + $0x6a8] sm:$0xff] %v2497_v45  ;;  %v2503_v57 = vclamps-f32 %v357_v54, 1.0 }
  0xa3   : > { %1888 = vst [vmem:[%s3082_s17 + $0x6b0] sm:$0xff] %v2498_v46  ;;  %1889 = vst [vmem:[%s3082_s17 + $0x6b8] sm:$0xff] %v2499_v47  ;;  %v2504_v58 = vclamps-f32 %v358_v55, 1.0  ;;  %v2505_v59 = vclamps-f32 %v359_v56, 1.0  ;;  %v360_v60 = vld [vmem:[%s3067_s30 + $0x6f0] sm:$0xff]  ;;  %v361_v61 = vld [vmem:[%s3067_s30 + $0x6f8] sm:$0xff] }
  0xa4   : > { %v362_v62 = vld [vmem:[%s3067_s30 + $0x700] sm:$0xff]  ;;  %1890 = vst [vmem:[%s3082_s17 + $0x6c0] sm:$0xff] %v2500_v51  ;;  %1891 = vst [vmem:[%s3082_s17 + $0x6c8] sm:$0xff] %v2501_v52  ;;  %v2506_v63 = vclamps-f32 %v360_v60, 1.0  ;;  %v2507_v0 = vclamps-f32 %v361_v61, 1.0  ;;  %v363_v2 = vld [vmem:[%s3067_s30 + $0x708] sm:$0xff] }
  0xa5   : > { %1892 = vst [vmem:[%s3082_s17 + $0x6d0] sm:$0xff] %v2502_v53  ;;  %v2508_v1 = vclamps-f32 %v362_v62, 1.0  ;;  %v364_v3 = vld [vmem:[%s3067_s30 + $0x710] sm:$0xff]  ;;  %v365_v4 = vld [vmem:[%s3067_s30 + $0x718] sm:$0xff]  ;;  %1893 = vst [vmem:[%s3082_s17 + $0x6d8] sm:$0xff] %v2503_v57  ;;  %v2509_v5 = vclamps-f32 %v363_v2, 1.0 }
  0xa6   : > { %1894 = vst [vmem:[%s3082_s17 + $0x6e0] sm:$0xff] %v2504_v58  ;;  %1895 = vst [vmem:[%s3082_s17 + $0x6e8] sm:$0xff] %v2505_v59  ;;  %v2510_v6 = vclamps-f32 %v364_v3, 1.0  ;;  %v2511_v7 = vclamps-f32 %v365_v4, 1.0  ;;  %v366_v8 = vld [vmem:[%s3067_s30 + $0x720] sm:$0xff]  ;;  %v367_v9 = vld [vmem:[%s3067_s30 + $0x728] sm:$0xff] }
  0xa7   : > { %v368_v10 = vld [vmem:[%s3067_s30 + $0x730] sm:$0xff]  ;;  %1896 = vst [vmem:[%s3082_s17 + $0x6f0] sm:$0xff] %v2506_v63  ;;  %1897 = vst [vmem:[%s3082_s17 + $0x6f8] sm:$0xff] %v2507_v0  ;;  %v2512_v11 = vclamps-f32 %v366_v8, 1.0  ;;  %v2513_v12 = vclamps-f32 %v367_v9, 1.0  ;;  %v369_v14 = vld [vmem:[%s3067_s30 + $0x738] sm:$0xff] }
  0xa8   : > { %1898 = vst [vmem:[%s3082_s17 + $0x700] sm:$0xff] %v2508_v1  ;;  %v2514_v13 = vclamps-f32 %v368_v10, 1.0  ;;  %v370_v15 = vld [vmem:[%s3067_s30 + $0x740] sm:$0xff]  ;;  %v371_v16 = vld [vmem:[%s3067_s30 + $0x748] sm:$0xff]  ;;  %1899 = vst [vmem:[%s3082_s17 + $0x708] sm:$0xff] %v2509_v5  ;;  %v2515_v17 = vclamps-f32 %v369_v14, 1.0 }
  0xa9   : > { %1900 = vst [vmem:[%s3082_s17 + $0x710] sm:$0xff] %v2510_v6  ;;  %1901 = vst [vmem:[%s3082_s17 + $0x718] sm:$0xff] %v2511_v7  ;;  %v2516_v18 = vclamps-f32 %v370_v15, 1.0  ;;  %v2517_v19 = vclamps-f32 %v371_v16, 1.0  ;;  %v372_v20 = vld [vmem:[%s3067_s30 + $0x750] sm:$0xff]  ;;  %v373_v21 = vld [vmem:[%s3067_s30 + $0x758] sm:$0xff] }
  0xaa   : > { %v374_v22 = vld [vmem:[%s3067_s30 + $0x760] sm:$0xff]  ;;  %1902 = vst [vmem:[%s3082_s17 + $0x720] sm:$0xff] %v2512_v11  ;;  %1903 = vst [vmem:[%s3082_s17 + $0x728] sm:$0xff] %v2513_v12  ;;  %v2518_v23 = vclamps-f32 %v372_v20, 1.0  ;;  %v2519_v24 = vclamps-f32 %v373_v21, 1.0  ;;  %v375_v26 = vld [vmem:[%s3067_s30 + $0x768] sm:$0xff] }
  0xab   : > { %1904 = vst [vmem:[%s3082_s17 + $0x730] sm:$0xff] %v2514_v13  ;;  %v2520_v25 = vclamps-f32 %v374_v22, 1.0  ;;  %v376_v27 = vld [vmem:[%s3067_s30 + $0x770] sm:$0xff]  ;;  %v377_v28 = vld [vmem:[%s3067_s30 + $0x778] sm:$0xff]  ;;  %1905 = vst [vmem:[%s3082_s17 + $0x738] sm:$0xff] %v2515_v17  ;;  %v2521_v29 = vclamps-f32 %v375_v26, 1.0 }
  0xac   : > { %1906 = vst [vmem:[%s3082_s17 + $0x740] sm:$0xff] %v2516_v18  ;;  %1907 = vst [vmem:[%s3082_s17 + $0x748] sm:$0xff] %v2517_v19  ;;  %v2522_v30 = vclamps-f32 %v376_v27, 1.0  ;;  %v2523_v31 = vclamps-f32 %v377_v28, 1.0  ;;  %v378_v32 = vld [vmem:[%s3067_s30 + $0x780] sm:$0xff]  ;;  %v379_v33 = vld [vmem:[%s3067_s30 + $0x788] sm:$0xff] }
  0xad   : > { %v380_v34 = vld [vmem:[%s3067_s30 + $0x790] sm:$0xff]  ;;  %1908 = vst [vmem:[%s3082_s17 + $0x750] sm:$0xff] %v2518_v23  ;;  %1909 = vst [vmem:[%s3082_s17 + $0x758] sm:$0xff] %v2519_v24  ;;  %v2524_v35 = vclamps-f32 %v378_v32, 1.0  ;;  %v2525_v36 = vclamps-f32 %v379_v33, 1.0  ;;  %v381_v38 = vld [vmem:[%s3067_s30 + $0x798] sm:$0xff] }
  0xae   : > { %1910 = vst [vmem:[%s3082_s17 + $0x760] sm:$0xff] %v2520_v25  ;;  %v2526_v37 = vclamps-f32 %v380_v34, 1.0  ;;  %v382_v39 = vld [vmem:[%s3067_s30 + $0x7a0] sm:$0xff]  ;;  %v383_v40 = vld [vmem:[%s3067_s30 + $0x7a8] sm:$0xff]  ;;  %1911 = vst [vmem:[%s3082_s17 + $0x768] sm:$0xff] %v2521_v29  ;;  %v2527_v41 = vclamps-f32 %v381_v38, 1.0 }
  0xaf   : > { %1912 = vst [vmem:[%s3082_s17 + $0x770] sm:$0xff] %v2522_v30  ;;  %1913 = vst [vmem:[%s3082_s17 + $0x778] sm:$0xff] %v2523_v31  ;;  %v2528_v42 = vclamps-f32 %v382_v39, 1.0  ;;  %v2529_v43 = vclamps-f32 %v383_v40, 1.0  ;;  %v384_v44 = vld [vmem:[%s3067_s30 + $0x7b0] sm:$0xff]  ;;  %v385_v45 = vld [vmem:[%s3067_s30 + $0x7b8] sm:$0xff] }
  0xb0   : > { %v386_v46 = vld [vmem:[%s3067_s30 + $0x7c0] sm:$0xff]  ;;  %1914 = vst [vmem:[%s3082_s17 + $0x780] sm:$0xff] %v2524_v35  ;;  %1915 = vst [vmem:[%s3082_s17 + $0x788] sm:$0xff] %v2525_v36  ;;  %v2530_v47 = vclamps-f32 %v384_v44, 1.0  ;;  %v2531_v48 = vclamps-f32 %v385_v45, 1.0  ;;  %v387_v50 = vld [vmem:[%s3067_s30 + $0x7c8] sm:$0xff] }
  0xb1   : > { %1916 = vst [vmem:[%s3082_s17 + $0x790] sm:$0xff] %v2526_v37  ;;  %v2532_v49 = vclamps-f32 %v386_v46, 1.0  ;;  %v388_v51 = vld [vmem:[%s3067_s30 + $0x7d0] sm:$0xff]  ;;  %v389_v52 = vld [vmem:[%s3067_s30 + $0x7d8] sm:$0xff]  ;;  %1917 = vst [vmem:[%s3082_s17 + $0x798] sm:$0xff] %v2527_v41  ;;  %v2533_v53 = vclamps-f32 %v387_v50, 1.0 }
  0xb2   : > { %1918 = vst [vmem:[%s3082_s17 + $0x7a0] sm:$0xff] %v2528_v42  ;;  %1919 = vst [vmem:[%s3082_s17 + $0x7a8] sm:$0xff] %v2529_v43  ;;  %v2534_v54 = vclamps-f32 %v388_v51, 1.0  ;;  %v2535_v55 = vclamps-f32 %v389_v52, 1.0  ;;  %v390_v56 = vld [vmem:[%s3067_s30 + $0x7e0] sm:$0xff]  ;;  %v391_v57 = vld [vmem:[%s3067_s30 + $0x7e8] sm:$0xff] }
  0xb3   : > { %v392_v58 = vld [vmem:[%s3067_s30 + $0x7f0] sm:$0xff]  ;;  %1920 = vst [vmem:[%s3082_s17 + $0x7b0] sm:$0xff] %v2530_v47  ;;  %1921 = vst [vmem:[%s3082_s17 + $0x7b8] sm:$0xff] %v2531_v48  ;;  %v2536_v59 = vclamps-f32 %v390_v56, 1.0  ;;  %v2537_v60 = vclamps-f32 %v391_v57, 1.0  ;;  %v393_v62 = vld [vmem:[%s3067_s30 + $0x7f8] sm:$0xff] }
  0xb4   : > { %1922 = vst [vmem:[%s3082_s17 + $0x7c0] sm:$0xff] %v2532_v49  ;;  %v2538_v61 = vclamps-f32 %v392_v58, 1.0  ;;  %v394_v63 = vld [vmem:[%s3067_s30 + $0x800] sm:$0xff]  ;;  %v395_v0 = vld [vmem:[%s3067_s30 + $0x808] sm:$0xff]  ;;  %1923 = vst [vmem:[%s3082_s17 + $0x7c8] sm:$0xff] %v2533_v53  ;;  %v2539_v1 = vclamps-f32 %v393_v62, 1.0 }
  0xb5   : > { %1924 = vst [vmem:[%s3082_s17 + $0x7d0] sm:$0xff] %v2534_v54  ;;  %1925 = vst [vmem:[%s3082_s17 + $0x7d8] sm:$0xff] %v2535_v55  ;;  %v2540_v2 = vclamps-f32 %v394_v63, 1.0  ;;  %v2541_v3 = vclamps-f32 %v395_v0, 1.0  ;;  %v396_v4 = vld [vmem:[%s3067_s30 + $0x810] sm:$0xff]  ;;  %v397_v5 = vld [vmem:[%s3067_s30 + $0x818] sm:$0xff] }
  0xb6   : > { %v398_v6 = vld [vmem:[%s3067_s30 + $0x820] sm:$0xff]  ;;  %1926 = vst [vmem:[%s3082_s17 + $0x7e0] sm:$0xff] %v2536_v59  ;;  %1927 = vst [vmem:[%s3082_s17 + $0x7e8] sm:$0xff] %v2537_v60  ;;  %v2542_v7 = vclamps-f32 %v396_v4, 1.0  ;;  %v2543_v8 = vclamps-f32 %v397_v5, 1.0  ;;  %v399_v10 = vld [vmem:[%s3067_s30 + $0x828] sm:$0xff] }
  0xb7   : > { %1928 = vst [vmem:[%s3082_s17 + $0x7f0] sm:$0xff] %v2538_v61  ;;  %v2544_v9 = vclamps-f32 %v398_v6, 1.0  ;;  %v400_v11 = vld [vmem:[%s3067_s30 + $0x830] sm:$0xff]  ;;  %v401_v12 = vld [vmem:[%s3067_s30 + $0x838] sm:$0xff]  ;;  %1929 = vst [vmem:[%s3082_s17 + $0x7f8] sm:$0xff] %v2539_v1  ;;  %v2545_v13 = vclamps-f32 %v399_v10, 1.0 }
  0xb8   : > { %1930 = vst [vmem:[%s3082_s17 + $0x800] sm:$0xff] %v2540_v2  ;;  %1931 = vst [vmem:[%s3082_s17 + $0x808] sm:$0xff] %v2541_v3  ;;  %v2546_v14 = vclamps-f32 %v400_v11, 1.0  ;;  %v2547_v15 = vclamps-f32 %v401_v12, 1.0  ;;  %v402_v16 = vld [vmem:[%s3067_s30 + $0x840] sm:$0xff]  ;;  %v403_v17 = vld [vmem:[%s3067_s30 + $0x848] sm:$0xff] }
  0xb9   : > { %v404_v18 = vld [vmem:[%s3067_s30 + $0x850] sm:$0xff]  ;;  %1932 = vst [vmem:[%s3082_s17 + $0x810] sm:$0xff] %v2542_v7  ;;  %1933 = vst [vmem:[%s3082_s17 + $0x818] sm:$0xff] %v2543_v8  ;;  %v2548_v19 = vclamps-f32 %v402_v16, 1.0  ;;  %v2549_v20 = vclamps-f32 %v403_v17, 1.0  ;;  %v405_v22 = vld [vmem:[%s3067_s30 + $0x858] sm:$0xff] }
  0xba   : > { %1934 = vst [vmem:[%s3082_s17 + $0x820] sm:$0xff] %v2544_v9  ;;  %v2550_v21 = vclamps-f32 %v404_v18, 1.0  ;;  %v406_v23 = vld [vmem:[%s3067_s30 + $0x860] sm:$0xff]  ;;  %v407_v24 = vld [vmem:[%s3067_s30 + $0x868] sm:$0xff]  ;;  %1935 = vst [vmem:[%s3082_s17 + $0x828] sm:$0xff] %v2545_v13  ;;  %v2551_v25 = vclamps-f32 %v405_v22, 1.0 }
  0xbb   : > { %1936 = vst [vmem:[%s3082_s17 + $0x830] sm:$0xff] %v2546_v14  ;;  %1937 = vst [vmem:[%s3082_s17 + $0x838] sm:$0xff] %v2547_v15  ;;  %v2552_v26 = vclamps-f32 %v406_v23, 1.0  ;;  %v2553_v27 = vclamps-f32 %v407_v24, 1.0  ;;  %v408_v28 = vld [vmem:[%s3067_s30 + $0x870] sm:$0xff]  ;;  %v409_v29 = vld [vmem:[%s3067_s30 + $0x878] sm:$0xff] }
  0xbc   : > { %v410_v30 = vld [vmem:[%s3067_s30 + $0x880] sm:$0xff]  ;;  %1938 = vst [vmem:[%s3082_s17 + $0x840] sm:$0xff] %v2548_v19  ;;  %1939 = vst [vmem:[%s3082_s17 + $0x848] sm:$0xff] %v2549_v20  ;;  %v2554_v31 = vclamps-f32 %v408_v28, 1.0  ;;  %v2555_v32 = vclamps-f32 %v409_v29, 1.0  ;;  %v411_v34 = vld [vmem:[%s3067_s30 + $0x888] sm:$0xff] }
  0xbd   : > { %1940 = vst [vmem:[%s3082_s17 + $0x850] sm:$0xff] %v2550_v21  ;;  %v2556_v33 = vclamps-f32 %v410_v30, 1.0  ;;  %v412_v35 = vld [vmem:[%s3067_s30 + $0x890] sm:$0xff]  ;;  %v413_v36 = vld [vmem:[%s3067_s30 + $0x898] sm:$0xff]  ;;  %1941 = vst [vmem:[%s3082_s17 + $0x858] sm:$0xff] %v2551_v25  ;;  %v2557_v37 = vclamps-f32 %v411_v34, 1.0 }
  0xbe   : > { %1942 = vst [vmem:[%s3082_s17 + $0x860] sm:$0xff] %v2552_v26  ;;  %1943 = vst [vmem:[%s3082_s17 + $0x868] sm:$0xff] %v2553_v27  ;;  %v2558_v38 = vclamps-f32 %v412_v35, 1.0  ;;  %v2559_v39 = vclamps-f32 %v413_v36, 1.0  ;;  %v414_v40 = vld [vmem:[%s3067_s30 + $0x8a0] sm:$0xff]  ;;  %v415_v41 = vld [vmem:[%s3067_s30 + $0x8a8] sm:$0xff] }
  0xbf   : > { %v416_v42 = vld [vmem:[%s3067_s30 + $0x8b0] sm:$0xff]  ;;  %1944 = vst [vmem:[%s3082_s17 + $0x870] sm:$0xff] %v2554_v31  ;;  %1945 = vst [vmem:[%s3082_s17 + $0x878] sm:$0xff] %v2555_v32  ;;  %v2560_v43 = vclamps-f32 %v414_v40, 1.0  ;;  %v2561_v44 = vclamps-f32 %v415_v41, 1.0  ;;  %v417_v46 = vld [vmem:[%s3067_s30 + $0x8b8] sm:$0xff] }
  0xc0   : > { %1946 = vst [vmem:[%s3082_s17 + $0x880] sm:$0xff] %v2556_v33  ;;  %v2562_v45 = vclamps-f32 %v416_v42, 1.0  ;;  %v418_v47 = vld [vmem:[%s3067_s30 + $0x8c0] sm:$0xff]  ;;  %v419_v48 = vld [vmem:[%s3067_s30 + $0x8c8] sm:$0xff]  ;;  %1947 = vst [vmem:[%s3082_s17 + $0x888] sm:$0xff] %v2557_v37  ;;  %v2563_v49 = vclamps-f32 %v417_v46, 1.0 }
  0xc1   : > { %1948 = vst [vmem:[%s3082_s17 + $0x890] sm:$0xff] %v2558_v38  ;;  %1949 = vst [vmem:[%s3082_s17 + $0x898] sm:$0xff] %v2559_v39  ;;  %v2564_v50 = vclamps-f32 %v418_v47, 1.0  ;;  %v2565_v51 = vclamps-f32 %v419_v48, 1.0  ;;  %v420_v52 = vld [vmem:[%s3067_s30 + $0x8d0] sm:$0xff]  ;;  %v421_v53 = vld [vmem:[%s3067_s30 + $0x8d8] sm:$0xff] }
  0xc2   : > { %v422_v54 = vld [vmem:[%s3067_s30 + $0x8e0] sm:$0xff]  ;;  %1950 = vst [vmem:[%s3082_s17 + $0x8a0] sm:$0xff] %v2560_v43  ;;  %1951 = vst [vmem:[%s3082_s17 + $0x8a8] sm:$0xff] %v2561_v44  ;;  %v2566_v55 = vclamps-f32 %v420_v52, 1.0  ;;  %v2567_v56 = vclamps-f32 %v421_v53, 1.0  ;;  %v423_v58 = vld [vmem:[%s3067_s30 + $0x8e8] sm:$0xff] }
  0xc3   : > { %1952 = vst [vmem:[%s3082_s17 + $0x8b0] sm:$0xff] %v2562_v45  ;;  %v2568_v57 = vclamps-f32 %v422_v54, 1.0  ;;  %v424_v59 = vld [vmem:[%s3067_s30 + $0x8f0] sm:$0xff]  ;;  %v425_v60 = vld [vmem:[%s3067_s30 + $0x8f8] sm:$0xff]  ;;  %1953 = vst [vmem:[%s3082_s17 + $0x8b8] sm:$0xff] %v2563_v49  ;;  %v2569_v61 = vclamps-f32 %v423_v58, 1.0 }
  0xc4   : > { %1954 = vst [vmem:[%s3082_s17 + $0x8c0] sm:$0xff] %v2564_v50  ;;  %1955 = vst [vmem:[%s3082_s17 + $0x8c8] sm:$0xff] %v2565_v51  ;;  %v2570_v62 = vclamps-f32 %v424_v59, 1.0  ;;  %v2571_v63 = vclamps-f32 %v425_v60, 1.0  ;;  %v426_v0 = vld [vmem:[%s3067_s30 + $0x900] sm:$0xff]  ;;  %v427_v1 = vld [vmem:[%s3067_s30 + $0x908] sm:$0xff] }
  0xc5   : > { %v428_v2 = vld [vmem:[%s3067_s30 + $0x910] sm:$0xff]  ;;  %1956 = vst [vmem:[%s3082_s17 + $0x8d0] sm:$0xff] %v2566_v55  ;;  %1957 = vst [vmem:[%s3082_s17 + $0x8d8] sm:$0xff] %v2567_v56  ;;  %v2572_v3 = vclamps-f32 %v426_v0, 1.0  ;;  %v2573_v4 = vclamps-f32 %v427_v1, 1.0  ;;  %v429_v6 = vld [vmem:[%s3067_s30 + $0x918] sm:$0xff] }
  0xc6   : > { %1958 = vst [vmem:[%s3082_s17 + $0x8e0] sm:$0xff] %v2568_v57  ;;  %v2574_v5 = vclamps-f32 %v428_v2, 1.0  ;;  %v430_v7 = vld [vmem:[%s3067_s30 + $0x920] sm:$0xff]  ;;  %v431_v8 = vld [vmem:[%s3067_s30 + $0x928] sm:$0xff]  ;;  %1959 = vst [vmem:[%s3082_s17 + $0x8e8] sm:$0xff] %v2569_v61  ;;  %v2575_v9 = vclamps-f32 %v429_v6, 1.0 }
  0xc7   : > { %1960 = vst [vmem:[%s3082_s17 + $0x8f0] sm:$0xff] %v2570_v62  ;;  %1961 = vst [vmem:[%s3082_s17 + $0x8f8] sm:$0xff] %v2571_v63  ;;  %v2576_v10 = vclamps-f32 %v430_v7, 1.0  ;;  %v2577_v11 = vclamps-f32 %v431_v8, 1.0  ;;  %v432_v12 = vld [vmem:[%s3067_s30 + $0x930] sm:$0xff]  ;;  %v433_v13 = vld [vmem:[%s3067_s30 + $0x938] sm:$0xff] }
  0xc8   : > { %v434_v14 = vld [vmem:[%s3067_s30 + $0x940] sm:$0xff]  ;;  %1962 = vst [vmem:[%s3082_s17 + $0x900] sm:$0xff] %v2572_v3  ;;  %1963 = vst [vmem:[%s3082_s17 + $0x908] sm:$0xff] %v2573_v4  ;;  %v2578_v15 = vclamps-f32 %v432_v12, 1.0  ;;  %v2579_v16 = vclamps-f32 %v433_v13, 1.0  ;;  %v435_v18 = vld [vmem:[%s3067_s30 + $0x948] sm:$0xff] }
  0xc9   : > { %1964 = vst [vmem:[%s3082_s17 + $0x910] sm:$0xff] %v2574_v5  ;;  %v2580_v17 = vclamps-f32 %v434_v14, 1.0  ;;  %v436_v19 = vld [vmem:[%s3067_s30 + $0x950] sm:$0xff]  ;;  %v437_v20 = vld [vmem:[%s3067_s30 + $0x958] sm:$0xff]  ;;  %1965 = vst [vmem:[%s3082_s17 + $0x918] sm:$0xff] %v2575_v9  ;;  %v2581_v21 = vclamps-f32 %v435_v18, 1.0 }
  0xca   : > { %1966 = vst [vmem:[%s3082_s17 + $0x920] sm:$0xff] %v2576_v10  ;;  %1967 = vst [vmem:[%s3082_s17 + $0x928] sm:$0xff] %v2577_v11  ;;  %v2582_v22 = vclamps-f32 %v436_v19, 1.0  ;;  %v2583_v23 = vclamps-f32 %v437_v20, 1.0  ;;  %v438_v24 = vld [vmem:[%s3067_s30 + $0x960] sm:$0xff]  ;;  %v439_v25 = vld [vmem:[%s3067_s30 + $0x968] sm:$0xff] }
  0xcb   : > { %v440_v26 = vld [vmem:[%s3067_s30 + $0x970] sm:$0xff]  ;;  %1968 = vst [vmem:[%s3082_s17 + $0x930] sm:$0xff] %v2578_v15  ;;  %1969 = vst [vmem:[%s3082_s17 + $0x938] sm:$0xff] %v2579_v16  ;;  %v2584_v27 = vclamps-f32 %v438_v24, 1.0  ;;  %v2585_v28 = vclamps-f32 %v439_v25, 1.0  ;;  %v441_v30 = vld [vmem:[%s3067_s30 + $0x978] sm:$0xff] }
  0xcc   : > { %1970 = vst [vmem:[%s3082_s17 + $0x940] sm:$0xff] %v2580_v17  ;;  %v2586_v29 = vclamps-f32 %v440_v26, 1.0  ;;  %v442_v31 = vld [vmem:[%s3067_s30 + $0x980] sm:$0xff]  ;;  %v443_v32 = vld [vmem:[%s3067_s30 + $0x988] sm:$0xff]  ;;  %1971 = vst [vmem:[%s3082_s17 + $0x948] sm:$0xff] %v2581_v21  ;;  %v2587_v33 = vclamps-f32 %v441_v30, 1.0 }
  0xcd   : > { %1972 = vst [vmem:[%s3082_s17 + $0x950] sm:$0xff] %v2582_v22  ;;  %1973 = vst [vmem:[%s3082_s17 + $0x958] sm:$0xff] %v2583_v23  ;;  %v2588_v34 = vclamps-f32 %v442_v31, 1.0  ;;  %v2589_v35 = vclamps-f32 %v443_v32, 1.0  ;;  %v444_v36 = vld [vmem:[%s3067_s30 + $0x990] sm:$0xff]  ;;  %v445_v37 = vld [vmem:[%s3067_s30 + $0x998] sm:$0xff] }
  0xce   : > { %v446_v38 = vld [vmem:[%s3067_s30 + $0x9a0] sm:$0xff]  ;;  %1974 = vst [vmem:[%s3082_s17 + $0x960] sm:$0xff] %v2584_v27  ;;  %1975 = vst [vmem:[%s3082_s17 + $0x968] sm:$0xff] %v2585_v28  ;;  %v2590_v39 = vclamps-f32 %v444_v36, 1.0  ;;  %v2591_v40 = vclamps-f32 %v445_v37, 1.0  ;;  %v447_v42 = vld [vmem:[%s3067_s30 + $0x9a8] sm:$0xff] }
  0xcf   : > { %1976 = vst [vmem:[%s3082_s17 + $0x970] sm:$0xff] %v2586_v29  ;;  %v2592_v41 = vclamps-f32 %v446_v38, 1.0  ;;  %v448_v43 = vld [vmem:[%s3067_s30 + $0x9b0] sm:$0xff]  ;;  %v449_v44 = vld [vmem:[%s3067_s30 + $0x9b8] sm:$0xff]  ;;  %1977 = vst [vmem:[%s3082_s17 + $0x978] sm:$0xff] %v2587_v33  ;;  %v2593_v45 = vclamps-f32 %v447_v42, 1.0 }
  0xd0   : > { %1978 = vst [vmem:[%s3082_s17 + $0x980] sm:$0xff] %v2588_v34  ;;  %1979 = vst [vmem:[%s3082_s17 + $0x988] sm:$0xff] %v2589_v35  ;;  %v2594_v46 = vclamps-f32 %v448_v43, 1.0  ;;  %v2595_v47 = vclamps-f32 %v449_v44, 1.0  ;;  %v450_v48 = vld [vmem:[%s3067_s30 + $0x9c0] sm:$0xff]  ;;  %v451_v49 = vld [vmem:[%s3067_s30 + $0x9c8] sm:$0xff] }
  0xd1   : > { %v452_v50 = vld [vmem:[%s3067_s30 + $0x9d0] sm:$0xff]  ;;  %1980 = vst [vmem:[%s3082_s17 + $0x990] sm:$0xff] %v2590_v39  ;;  %1981 = vst [vmem:[%s3082_s17 + $0x998] sm:$0xff] %v2591_v40  ;;  %v2596_v51 = vclamps-f32 %v450_v48, 1.0  ;;  %v2597_v52 = vclamps-f32 %v451_v49, 1.0  ;;  %v453_v54 = vld [vmem:[%s3067_s30 + $0x9d8] sm:$0xff] }
  0xd2   : > { %1982 = vst [vmem:[%s3082_s17 + $0x9a0] sm:$0xff] %v2592_v41  ;;  %v2598_v53 = vclamps-f32 %v452_v50, 1.0  ;;  %v454_v55 = vld [vmem:[%s3067_s30 + $0x9e0] sm:$0xff]  ;;  %v455_v56 = vld [vmem:[%s3067_s30 + $0x9e8] sm:$0xff]  ;;  %1983 = vst [vmem:[%s3082_s17 + $0x9a8] sm:$0xff] %v2593_v45  ;;  %v2599_v57 = vclamps-f32 %v453_v54, 1.0 }
  0xd3   : > { %1984 = vst [vmem:[%s3082_s17 + $0x9b0] sm:$0xff] %v2594_v46  ;;  %1985 = vst [vmem:[%s3082_s17 + $0x9b8] sm:$0xff] %v2595_v47  ;;  %v2600_v58 = vclamps-f32 %v454_v55, 1.0  ;;  %v2601_v59 = vclamps-f32 %v455_v56, 1.0  ;;  %v456_v60 = vld [vmem:[%s3067_s30 + $0x9f0] sm:$0xff]  ;;  %v457_v61 = vld [vmem:[%s3067_s30 + $0x9f8] sm:$0xff] }
  0xd4   : > { %v458_v62 = vld [vmem:[%s3067_s30 + $0xa00] sm:$0xff]  ;;  %1986 = vst [vmem:[%s3082_s17 + $0x9c0] sm:$0xff] %v2596_v51  ;;  %1987 = vst [vmem:[%s3082_s17 + $0x9c8] sm:$0xff] %v2597_v52  ;;  %v2602_v63 = vclamps-f32 %v456_v60, 1.0  ;;  %v2603_v0 = vclamps-f32 %v457_v61, 1.0  ;;  %v459_v2 = vld [vmem:[%s3067_s30 + $0xa08] sm:$0xff] }
  0xd5   : > { %1988 = vst [vmem:[%s3082_s17 + $0x9d0] sm:$0xff] %v2598_v53  ;;  %v2604_v1 = vclamps-f32 %v458_v62, 1.0  ;;  %v460_v3 = vld [vmem:[%s3067_s30 + $0xa10] sm:$0xff]  ;;  %v461_v4 = vld [vmem:[%s3067_s30 + $0xa18] sm:$0xff]  ;;  %1989 = vst [vmem:[%s3082_s17 + $0x9d8] sm:$0xff] %v2599_v57  ;;  %v2605_v5 = vclamps-f32 %v459_v2, 1.0 }
  0xd6   : > { %1990 = vst [vmem:[%s3082_s17 + $0x9e0] sm:$0xff] %v2600_v58  ;;  %1991 = vst [vmem:[%s3082_s17 + $0x9e8] sm:$0xff] %v2601_v59  ;;  %v2606_v6 = vclamps-f32 %v460_v3, 1.0  ;;  %v2607_v7 = vclamps-f32 %v461_v4, 1.0  ;;  %v462_v8 = vld [vmem:[%s3067_s30 + $0xa20] sm:$0xff]  ;;  %v463_v9 = vld [vmem:[%s3067_s30 + $0xa28] sm:$0xff] }
  0xd7   : > { %v464_v10 = vld [vmem:[%s3067_s30 + $0xa30] sm:$0xff]  ;;  %1992 = vst [vmem:[%s3082_s17 + $0x9f0] sm:$0xff] %v2602_v63  ;;  %1993 = vst [vmem:[%s3082_s17 + $0x9f8] sm:$0xff] %v2603_v0  ;;  %v2608_v11 = vclamps-f32 %v462_v8, 1.0  ;;  %v2609_v12 = vclamps-f32 %v463_v9, 1.0  ;;  %v465_v14 = vld [vmem:[%s3067_s30 + $0xa38] sm:$0xff] }
  0xd8   : > { %1994 = vst [vmem:[%s3082_s17 + $0xa00] sm:$0xff] %v2604_v1  ;;  %v2610_v13 = vclamps-f32 %v464_v10, 1.0  ;;  %v466_v15 = vld [vmem:[%s3067_s30 + $0xa40] sm:$0xff]  ;;  %v467_v16 = vld [vmem:[%s3067_s30 + $0xa48] sm:$0xff]  ;;  %1995 = vst [vmem:[%s3082_s17 + $0xa08] sm:$0xff] %v2605_v5  ;;  %v2611_v17 = vclamps-f32 %v465_v14, 1.0 }
  0xd9   : > { %1996 = vst [vmem:[%s3082_s17 + $0xa10] sm:$0xff] %v2606_v6  ;;  %1997 = vst [vmem:[%s3082_s17 + $0xa18] sm:$0xff] %v2607_v7  ;;  %v2612_v18 = vclamps-f32 %v466_v15, 1.0  ;;  %v2613_v19 = vclamps-f32 %v467_v16, 1.0  ;;  %v468_v20 = vld [vmem:[%s3067_s30 + $0xa50] sm:$0xff]  ;;  %v469_v21 = vld [vmem:[%s3067_s30 + $0xa58] sm:$0xff] }
  0xda   : > { %v470_v22 = vld [vmem:[%s3067_s30 + $0xa60] sm:$0xff]  ;;  %1998 = vst [vmem:[%s3082_s17 + $0xa20] sm:$0xff] %v2608_v11  ;;  %1999 = vst [vmem:[%s3082_s17 + $0xa28] sm:$0xff] %v2609_v12  ;;  %v2614_v23 = vclamps-f32 %v468_v20, 1.0  ;;  %v2615_v24 = vclamps-f32 %v469_v21, 1.0  ;;  %v471_v26 = vld [vmem:[%s3067_s30 + $0xa68] sm:$0xff] }
  0xdb   : > { %2000 = vst [vmem:[%s3082_s17 + $0xa30] sm:$0xff] %v2610_v13  ;;  %v2616_v25 = vclamps-f32 %v470_v22, 1.0  ;;  %v472_v27 = vld [vmem:[%s3067_s30 + $0xa70] sm:$0xff]  ;;  %v473_v28 = vld [vmem:[%s3067_s30 + $0xa78] sm:$0xff]  ;;  %2001 = vst [vmem:[%s3082_s17 + $0xa38] sm:$0xff] %v2611_v17  ;;  %v2617_v29 = vclamps-f32 %v471_v26, 1.0 }
  0xdc   : > { %2002 = vst [vmem:[%s3082_s17 + $0xa40] sm:$0xff] %v2612_v18  ;;  %2003 = vst [vmem:[%s3082_s17 + $0xa48] sm:$0xff] %v2613_v19  ;;  %v2618_v30 = vclamps-f32 %v472_v27, 1.0  ;;  %v2619_v31 = vclamps-f32 %v473_v28, 1.0  ;;  %v474_v32 = vld [vmem:[%s3067_s30 + $0xa80] sm:$0xff]  ;;  %v475_v33 = vld [vmem:[%s3067_s30 + $0xa88] sm:$0xff] }
  0xdd   : > { %v476_v34 = vld [vmem:[%s3067_s30 + $0xa90] sm:$0xff]  ;;  %2004 = vst [vmem:[%s3082_s17 + $0xa50] sm:$0xff] %v2614_v23  ;;  %2005 = vst [vmem:[%s3082_s17 + $0xa58] sm:$0xff] %v2615_v24  ;;  %v2620_v35 = vclamps-f32 %v474_v32, 1.0  ;;  %v2621_v36 = vclamps-f32 %v475_v33, 1.0  ;;  %v477_v38 = vld [vmem:[%s3067_s30 + $0xa98] sm:$0xff] }
  0xde   : > { %2006 = vst [vmem:[%s3082_s17 + $0xa60] sm:$0xff] %v2616_v25  ;;  %v2622_v37 = vclamps-f32 %v476_v34, 1.0  ;;  %v478_v39 = vld [vmem:[%s3067_s30 + $0xaa0] sm:$0xff]  ;;  %v479_v40 = vld [vmem:[%s3067_s30 + $0xaa8] sm:$0xff]  ;;  %2007 = vst [vmem:[%s3082_s17 + $0xa68] sm:$0xff] %v2617_v29  ;;  %v2623_v41 = vclamps-f32 %v477_v38, 1.0 }
  0xdf   : > { %2008 = vst [vmem:[%s3082_s17 + $0xa70] sm:$0xff] %v2618_v30  ;;  %2009 = vst [vmem:[%s3082_s17 + $0xa78] sm:$0xff] %v2619_v31  ;;  %v2624_v42 = vclamps-f32 %v478_v39, 1.0  ;;  %v2625_v43 = vclamps-f32 %v479_v40, 1.0  ;;  %v480_v44 = vld [vmem:[%s3067_s30 + $0xab0] sm:$0xff]  ;;  %v481_v45 = vld [vmem:[%s3067_s30 + $0xab8] sm:$0xff] }
  0xe0   : > { %v482_v46 = vld [vmem:[%s3067_s30 + $0xac0] sm:$0xff]  ;;  %2010 = vst [vmem:[%s3082_s17 + $0xa80] sm:$0xff] %v2620_v35  ;;  %2011 = vst [vmem:[%s3082_s17 + $0xa88] sm:$0xff] %v2621_v36  ;;  %v2626_v47 = vclamps-f32 %v480_v44, 1.0  ;;  %v2627_v48 = vclamps-f32 %v481_v45, 1.0  ;;  %v483_v50 = vld [vmem:[%s3067_s30 + $0xac8] sm:$0xff] }
  0xe1   : > { %2012 = vst [vmem:[%s3082_s17 + $0xa90] sm:$0xff] %v2622_v37  ;;  %v2628_v49 = vclamps-f32 %v482_v46, 1.0  ;;  %v484_v51 = vld [vmem:[%s3067_s30 + $0xad0] sm:$0xff]  ;;  %v485_v52 = vld [vmem:[%s3067_s30 + $0xad8] sm:$0xff]  ;;  %2013 = vst [vmem:[%s3082_s17 + $0xa98] sm:$0xff] %v2623_v41  ;;  %v2629_v53 = vclamps-f32 %v483_v50, 1.0 }
  0xe2   : > { %2014 = vst [vmem:[%s3082_s17 + $0xaa0] sm:$0xff] %v2624_v42  ;;  %2015 = vst [vmem:[%s3082_s17 + $0xaa8] sm:$0xff] %v2625_v43  ;;  %v2630_v54 = vclamps-f32 %v484_v51, 1.0  ;;  %v2631_v55 = vclamps-f32 %v485_v52, 1.0  ;;  %v486_v56 = vld [vmem:[%s3067_s30 + $0xae0] sm:$0xff]  ;;  %v487_v57 = vld [vmem:[%s3067_s30 + $0xae8] sm:$0xff] }
  0xe3   : > { %v488_v58 = vld [vmem:[%s3067_s30 + $0xaf0] sm:$0xff]  ;;  %2016 = vst [vmem:[%s3082_s17 + $0xab0] sm:$0xff] %v2626_v47  ;;  %2017 = vst [vmem:[%s3082_s17 + $0xab8] sm:$0xff] %v2627_v48  ;;  %v2632_v59 = vclamps-f32 %v486_v56, 1.0  ;;  %v2633_v60 = vclamps-f32 %v487_v57, 1.0  ;;  %v489_v62 = vld [vmem:[%s3067_s30 + $0xaf8] sm:$0xff] }
  0xe4   : > { %2018 = vst [vmem:[%s3082_s17 + $0xac0] sm:$0xff] %v2628_v49  ;;  %v2634_v61 = vclamps-f32 %v488_v58, 1.0  ;;  %v490_v63 = vld [vmem:[%s3067_s30 + $0xb00] sm:$0xff]  ;;  %v491_v0 = vld [vmem:[%s3067_s30 + $0xb08] sm:$0xff]  ;;  %2019 = vst [vmem:[%s3082_s17 + $0xac8] sm:$0xff] %v2629_v53  ;;  %v2635_v1 = vclamps-f32 %v489_v62, 1.0 }
  0xe5   : > { %2020 = vst [vmem:[%s3082_s17 + $0xad0] sm:$0xff] %v2630_v54  ;;  %2021 = vst [vmem:[%s3082_s17 + $0xad8] sm:$0xff] %v2631_v55  ;;  %v2636_v2 = vclamps-f32 %v490_v63, 1.0  ;;  %v2637_v3 = vclamps-f32 %v491_v0, 1.0  ;;  %v492_v4 = vld [vmem:[%s3067_s30 + $0xb10] sm:$0xff]  ;;  %v493_v5 = vld [vmem:[%s3067_s30 + $0xb18] sm:$0xff] }
  0xe6   : > { %v494_v6 = vld [vmem:[%s3067_s30 + $0xb20] sm:$0xff]  ;;  %2022 = vst [vmem:[%s3082_s17 + $0xae0] sm:$0xff] %v2632_v59  ;;  %2023 = vst [vmem:[%s3082_s17 + $0xae8] sm:$0xff] %v2633_v60  ;;  %v2638_v7 = vclamps-f32 %v492_v4, 1.0  ;;  %v2639_v8 = vclamps-f32 %v493_v5, 1.0  ;;  %v495_v10 = vld [vmem:[%s3067_s30 + $0xb28] sm:$0xff] }
  0xe7   : > { %2024 = vst [vmem:[%s3082_s17 + $0xaf0] sm:$0xff] %v2634_v61  ;;  %v2640_v9 = vclamps-f32 %v494_v6, 1.0  ;;  %v496_v11 = vld [vmem:[%s3067_s30 + $0xb30] sm:$0xff]  ;;  %v497_v12 = vld [vmem:[%s3067_s30 + $0xb38] sm:$0xff]  ;;  %2025 = vst [vmem:[%s3082_s17 + $0xaf8] sm:$0xff] %v2635_v1  ;;  %v2641_v13 = vclamps-f32 %v495_v10, 1.0 }
  0xe8   : > { %2026 = vst [vmem:[%s3082_s17 + $0xb00] sm:$0xff] %v2636_v2  ;;  %2027 = vst [vmem:[%s3082_s17 + $0xb08] sm:$0xff] %v2637_v3  ;;  %v2642_v14 = vclamps-f32 %v496_v11, 1.0  ;;  %v2643_v15 = vclamps-f32 %v497_v12, 1.0  ;;  %v498_v16 = vld [vmem:[%s3067_s30 + $0xb40] sm:$0xff]  ;;  %v499_v17 = vld [vmem:[%s3067_s30 + $0xb48] sm:$0xff] }
  0xe9   : > { %v500_v18 = vld [vmem:[%s3067_s30 + $0xb50] sm:$0xff]  ;;  %2028 = vst [vmem:[%s3082_s17 + $0xb10] sm:$0xff] %v2638_v7  ;;  %2029 = vst [vmem:[%s3082_s17 + $0xb18] sm:$0xff] %v2639_v8  ;;  %v2644_v19 = vclamps-f32 %v498_v16, 1.0  ;;  %v2645_v20 = vclamps-f32 %v499_v17, 1.0  ;;  %v501_v22 = vld [vmem:[%s3067_s30 + $0xb58] sm:$0xff] }
  0xea   : > { %2030 = vst [vmem:[%s3082_s17 + $0xb20] sm:$0xff] %v2640_v9  ;;  %v2646_v21 = vclamps-f32 %v500_v18, 1.0  ;;  %v502_v23 = vld [vmem:[%s3067_s30 + $0xb60] sm:$0xff]  ;;  %v503_v24 = vld [vmem:[%s3067_s30 + $0xb68] sm:$0xff]  ;;  %2031 = vst [vmem:[%s3082_s17 + $0xb28] sm:$0xff] %v2641_v13  ;;  %v2647_v25 = vclamps-f32 %v501_v22, 1.0 }
  0xeb   : > { %2032 = vst [vmem:[%s3082_s17 + $0xb30] sm:$0xff] %v2642_v14  ;;  %2033 = vst [vmem:[%s3082_s17 + $0xb38] sm:$0xff] %v2643_v15  ;;  %v2648_v26 = vclamps-f32 %v502_v23, 1.0  ;;  %v2649_v27 = vclamps-f32 %v503_v24, 1.0  ;;  %v504_v28 = vld [vmem:[%s3067_s30 + $0xb70] sm:$0xff]  ;;  %v505_v29 = vld [vmem:[%s3067_s30 + $0xb78] sm:$0xff] }
  0xec   : > { %v506_v30 = vld [vmem:[%s3067_s30 + $0xb80] sm:$0xff]  ;;  %2034 = vst [vmem:[%s3082_s17 + $0xb40] sm:$0xff] %v2644_v19  ;;  %2035 = vst [vmem:[%s3082_s17 + $0xb48] sm:$0xff] %v2645_v20  ;;  %v2650_v31 = vclamps-f32 %v504_v28, 1.0  ;;  %v2651_v32 = vclamps-f32 %v505_v29, 1.0  ;;  %v507_v34 = vld [vmem:[%s3067_s30 + $0xb88] sm:$0xff] }
  0xed   : > { %2036 = vst [vmem:[%s3082_s17 + $0xb50] sm:$0xff] %v2646_v21  ;;  %v2652_v33 = vclamps-f32 %v506_v30, 1.0  ;;  %v508_v35 = vld [vmem:[%s3067_s30 + $0xb90] sm:$0xff]  ;;  %v509_v36 = vld [vmem:[%s3067_s30 + $0xb98] sm:$0xff]  ;;  %2037 = vst [vmem:[%s3082_s17 + $0xb58] sm:$0xff] %v2647_v25  ;;  %v2653_v37 = vclamps-f32 %v507_v34, 1.0 }
  0xee   : > { %2038 = vst [vmem:[%s3082_s17 + $0xb60] sm:$0xff] %v2648_v26  ;;  %2039 = vst [vmem:[%s3082_s17 + $0xb68] sm:$0xff] %v2649_v27  ;;  %v2654_v38 = vclamps-f32 %v508_v35, 1.0  ;;  %v2655_v39 = vclamps-f32 %v509_v36, 1.0  ;;  %v510_v40 = vld [vmem:[%s3067_s30 + $0xba0] sm:$0xff]  ;;  %v511_v41 = vld [vmem:[%s3067_s30 + $0xba8] sm:$0xff] }
  0xef   : > { %v512_v42 = vld [vmem:[%s3067_s30 + $0xbb0] sm:$0xff]  ;;  %2040 = vst [vmem:[%s3082_s17 + $0xb70] sm:$0xff] %v2650_v31  ;;  %2041 = vst [vmem:[%s3082_s17 + $0xb78] sm:$0xff] %v2651_v32  ;;  %v2656_v43 = vclamps-f32 %v510_v40, 1.0  ;;  %v2657_v44 = vclamps-f32 %v511_v41, 1.0  ;;  %v513_v46 = vld [vmem:[%s3067_s30 + $0xbb8] sm:$0xff] }
  0xf0   : > { %2042 = vst [vmem:[%s3082_s17 + $0xb80] sm:$0xff] %v2652_v33  ;;  %v2658_v45 = vclamps-f32 %v512_v42, 1.0  ;;  %v514_v47 = vld [vmem:[%s3067_s30 + $0xbc0] sm:$0xff]  ;;  %v515_v48 = vld [vmem:[%s3067_s30 + $0xbc8] sm:$0xff]  ;;  %2043 = vst [vmem:[%s3082_s17 + $0xb88] sm:$0xff] %v2653_v37  ;;  %v2659_v49 = vclamps-f32 %v513_v46, 1.0 }
  0xf1   : > { %2044 = vst [vmem:[%s3082_s17 + $0xb90] sm:$0xff] %v2654_v38  ;;  %2045 = vst [vmem:[%s3082_s17 + $0xb98] sm:$0xff] %v2655_v39  ;;  %v2660_v50 = vclamps-f32 %v514_v47, 1.0  ;;  %v2661_v51 = vclamps-f32 %v515_v48, 1.0  ;;  %v516_v52 = vld [vmem:[%s3067_s30 + $0xbd0] sm:$0xff]  ;;  %v517_v53 = vld [vmem:[%s3067_s30 + $0xbd8] sm:$0xff] }
  0xf2   : > { %v518_v54 = vld [vmem:[%s3067_s30 + $0xbe0] sm:$0xff]  ;;  %2046 = vst [vmem:[%s3082_s17 + $0xba0] sm:$0xff] %v2656_v43  ;;  %2047 = vst [vmem:[%s3082_s17 + $0xba8] sm:$0xff] %v2657_v44  ;;  %v2662_v55 = vclamps-f32 %v516_v52, 1.0  ;;  %v2663_v56 = vclamps-f32 %v517_v53, 1.0  ;;  %v519_v58 = vld [vmem:[%s3067_s30 + $0xbe8] sm:$0xff] }
  0xf3   : > { %2048 = vst [vmem:[%s3082_s17 + $0xbb0] sm:$0xff] %v2658_v45  ;;  %v2664_v57 = vclamps-f32 %v518_v54, 1.0  ;;  %v520_v59 = vld [vmem:[%s3067_s30 + $0xbf0] sm:$0xff]  ;;  %v521_v60 = vld [vmem:[%s3067_s30 + $0xbf8] sm:$0xff]  ;;  %2049 = vst [vmem:[%s3082_s17 + $0xbb8] sm:$0xff] %v2659_v49  ;;  %v2665_v61 = vclamps-f32 %v519_v58, 1.0 }
  0xf4   : > { %2050 = vst [vmem:[%s3082_s17 + $0xbc0] sm:$0xff] %v2660_v50  ;;  %2051 = vst [vmem:[%s3082_s17 + $0xbc8] sm:$0xff] %v2661_v51  ;;  %v2666_v62 = vclamps-f32 %v520_v59, 1.0  ;;  %v2667_v63 = vclamps-f32 %v521_v60, 1.0  ;;  %v522_v0 = vld [vmem:[%s3067_s30 + $0xc00] sm:$0xff]  ;;  %v523_v1 = vld [vmem:[%s3067_s30 + $0xc08] sm:$0xff] }
  0xf5   : > { %v524_v2 = vld [vmem:[%s3067_s30 + $0xc10] sm:$0xff]  ;;  %2052 = vst [vmem:[%s3082_s17 + $0xbd0] sm:$0xff] %v2662_v55  ;;  %2053 = vst [vmem:[%s3082_s17 + $0xbd8] sm:$0xff] %v2663_v56  ;;  %v2668_v3 = vclamps-f32 %v522_v0, 1.0  ;;  %v2669_v4 = vclamps-f32 %v523_v1, 1.0  ;;  %v525_v6 = vld [vmem:[%s3067_s30 + $0xc18] sm:$0xff] }
  0xf6   : > { %2054 = vst [vmem:[%s3082_s17 + $0xbe0] sm:$0xff] %v2664_v57  ;;  %v2670_v5 = vclamps-f32 %v524_v2, 1.0  ;;  %v526_v7 = vld [vmem:[%s3067_s30 + $0xc20] sm:$0xff]  ;;  %v527_v8 = vld [vmem:[%s3067_s30 + $0xc28] sm:$0xff]  ;;  %2055 = vst [vmem:[%s3082_s17 + $0xbe8] sm:$0xff] %v2665_v61  ;;  %v2671_v9 = vclamps-f32 %v525_v6, 1.0 }
  0xf7   : > { %2056 = vst [vmem:[%s3082_s17 + $0xbf0] sm:$0xff] %v2666_v62  ;;  %2057 = vst [vmem:[%s3082_s17 + $0xbf8] sm:$0xff] %v2667_v63  ;;  %v2672_v10 = vclamps-f32 %v526_v7, 1.0  ;;  %v2673_v11 = vclamps-f32 %v527_v8, 1.0  ;;  %v528_v12 = vld [vmem:[%s3067_s30 + $0xc30] sm:$0xff]  ;;  %v529_v13 = vld [vmem:[%s3067_s30 + $0xc38] sm:$0xff] }
  0xf8   : > { %v530_v14 = vld [vmem:[%s3067_s30 + $0xc40] sm:$0xff]  ;;  %2058 = vst [vmem:[%s3082_s17 + $0xc00] sm:$0xff] %v2668_v3  ;;  %2059 = vst [vmem:[%s3082_s17 + $0xc08] sm:$0xff] %v2669_v4  ;;  %v2674_v15 = vclamps-f32 %v528_v12, 1.0  ;;  %v2675_v16 = vclamps-f32 %v529_v13, 1.0  ;;  %v531_v18 = vld [vmem:[%s3067_s30 + $0xc48] sm:$0xff] }
  0xf9   : > { %2060 = vst [vmem:[%s3082_s17 + $0xc10] sm:$0xff] %v2670_v5  ;;  %v2676_v17 = vclamps-f32 %v530_v14, 1.0  ;;  %v532_v19 = vld [vmem:[%s3067_s30 + $0xc50] sm:$0xff]  ;;  %v533_v20 = vld [vmem:[%s3067_s30 + $0xc58] sm:$0xff]  ;;  %2061 = vst [vmem:[%s3082_s17 + $0xc18] sm:$0xff] %v2671_v9  ;;  %v2677_v21 = vclamps-f32 %v531_v18, 1.0 }
  0xfa   : > { %2062 = vst [vmem:[%s3082_s17 + $0xc20] sm:$0xff] %v2672_v10  ;;  %2063 = vst [vmem:[%s3082_s17 + $0xc28] sm:$0xff] %v2673_v11  ;;  %v2678_v22 = vclamps-f32 %v532_v19, 1.0  ;;  %v2679_v23 = vclamps-f32 %v533_v20, 1.0  ;;  %v534_v24 = vld [vmem:[%s3067_s30 + $0xc60] sm:$0xff]  ;;  %v535_v25 = vld [vmem:[%s3067_s30 + $0xc68] sm:$0xff] }
  0xfb   : > { %v536_v26 = vld [vmem:[%s3067_s30 + $0xc70] sm:$0xff]  ;;  %2064 = vst [vmem:[%s3082_s17 + $0xc30] sm:$0xff] %v2674_v15  ;;  %2065 = vst [vmem:[%s3082_s17 + $0xc38] sm:$0xff] %v2675_v16  ;;  %v2680_v27 = vclamps-f32 %v534_v24, 1.0  ;;  %v2681_v28 = vclamps-f32 %v535_v25, 1.0  ;;  %v537_v30 = vld [vmem:[%s3067_s30 + $0xc78] sm:$0xff] }
  0xfc   : > { %2066 = vst [vmem:[%s3082_s17 + $0xc40] sm:$0xff] %v2676_v17  ;;  %v2682_v29 = vclamps-f32 %v536_v26, 1.0  ;;  %v538_v31 = vld [vmem:[%s3067_s30 + $0xc80] sm:$0xff]  ;;  %v539_v32 = vld [vmem:[%s3067_s30 + $0xc88] sm:$0xff]  ;;  %2067 = vst [vmem:[%s3082_s17 + $0xc48] sm:$0xff] %v2677_v21  ;;  %v2683_v33 = vclamps-f32 %v537_v30, 1.0 }
  0xfd   : > { %2068 = vst [vmem:[%s3082_s17 + $0xc50] sm:$0xff] %v2678_v22  ;;  %2069 = vst [vmem:[%s3082_s17 + $0xc58] sm:$0xff] %v2679_v23  ;;  %v2684_v34 = vclamps-f32 %v538_v31, 1.0  ;;  %v2685_v35 = vclamps-f32 %v539_v32, 1.0  ;;  %v540_v36 = vld [vmem:[%s3067_s30 + $0xc90] sm:$0xff]  ;;  %v541_v37 = vld [vmem:[%s3067_s30 + $0xc98] sm:$0xff] }
  0xfe   : > { %v542_v38 = vld [vmem:[%s3067_s30 + $0xca0] sm:$0xff]  ;;  %2070 = vst [vmem:[%s3082_s17 + $0xc60] sm:$0xff] %v2680_v27  ;;  %2071 = vst [vmem:[%s3082_s17 + $0xc68] sm:$0xff] %v2681_v28  ;;  %v2686_v39 = vclamps-f32 %v540_v36, 1.0  ;;  %v2687_v40 = vclamps-f32 %v541_v37, 1.0  ;;  %v543_v42 = vld [vmem:[%s3067_s30 + $0xca8] sm:$0xff] }
  0xff   : > { %2072 = vst [vmem:[%s3082_s17 + $0xc70] sm:$0xff] %v2682_v29  ;;  %v2688_v41 = vclamps-f32 %v542_v38, 1.0  ;;  %v544_v43 = vld [vmem:[%s3067_s30 + $0xcb0] sm:$0xff]  ;;  %v545_v44 = vld [vmem:[%s3067_s30 + $0xcb8] sm:$0xff]  ;;  %2073 = vst [vmem:[%s3082_s17 + $0xc78] sm:$0xff] %v2683_v33  ;;  %v2689_v45 = vclamps-f32 %v543_v42, 1.0 }
 0x100   : > { %2074 = vst [vmem:[%s3082_s17 + $0xc80] sm:$0xff] %v2684_v34  ;;  %2075 = vst [vmem:[%s3082_s17 + $0xc88] sm:$0xff] %v2685_v35  ;;  %v2690_v46 = vclamps-f32 %v544_v43, 1.0  ;;  %v2691_v47 = vclamps-f32 %v545_v44, 1.0  ;;  %v546_v48 = vld [vmem:[%s3067_s30 + $0xcc0] sm:$0xff]  ;;  %v547_v49 = vld [vmem:[%s3067_s30 + $0xcc8] sm:$0xff] }
 0x101   : > { %v548_v50 = vld [vmem:[%s3067_s30 + $0xcd0] sm:$0xff]  ;;  %2076 = vst [vmem:[%s3082_s17 + $0xc90] sm:$0xff] %v2686_v39  ;;  %2077 = vst [vmem:[%s3082_s17 + $0xc98] sm:$0xff] %v2687_v40  ;;  %v2692_v51 = vclamps-f32 %v546_v48, 1.0  ;;  %v2693_v52 = vclamps-f32 %v547_v49, 1.0  ;;  %v549_v54 = vld [vmem:[%s3067_s30 + $0xcd8] sm:$0xff] }
 0x102   : > { %2078 = vst [vmem:[%s3082_s17 + $0xca0] sm:$0xff] %v2688_v41  ;;  %v2694_v53 = vclamps-f32 %v548_v50, 1.0  ;;  %v550_v55 = vld [vmem:[%s3067_s30 + $0xce0] sm:$0xff]  ;;  %v551_v56 = vld [vmem:[%s3067_s30 + $0xce8] sm:$0xff]  ;;  %2079 = vst [vmem:[%s3082_s17 + $0xca8] sm:$0xff] %v2689_v45  ;;  %v2695_v57 = vclamps-f32 %v549_v54, 1.0 }
 0x103   : > { %2080 = vst [vmem:[%s3082_s17 + $0xcb0] sm:$0xff] %v2690_v46  ;;  %2081 = vst [vmem:[%s3082_s17 + $0xcb8] sm:$0xff] %v2691_v47  ;;  %v2696_v58 = vclamps-f32 %v550_v55, 1.0  ;;  %v2697_v59 = vclamps-f32 %v551_v56, 1.0  ;;  %v552_v60 = vld [vmem:[%s3067_s30 + $0xcf0] sm:$0xff]  ;;  %v553_v61 = vld [vmem:[%s3067_s30 + $0xcf8] sm:$0xff] }
 0x104   : > { %v554_v62 = vld [vmem:[%s3067_s30 + $0xd00] sm:$0xff]  ;;  %2082 = vst [vmem:[%s3082_s17 + $0xcc0] sm:$0xff] %v2692_v51  ;;  %2083 = vst [vmem:[%s3082_s17 + $0xcc8] sm:$0xff] %v2693_v52  ;;  %v2698_v63 = vclamps-f32 %v552_v60, 1.0  ;;  %v2699_v0 = vclamps-f32 %v553_v61, 1.0  ;;  %v555_v2 = vld [vmem:[%s3067_s30 + $0xd08] sm:$0xff] }
 0x105   : > { %2084 = vst [vmem:[%s3082_s17 + $0xcd0] sm:$0xff] %v2694_v53  ;;  %v2700_v1 = vclamps-f32 %v554_v62, 1.0  ;;  %v556_v3 = vld [vmem:[%s3067_s30 + $0xd10] sm:$0xff]  ;;  %v557_v4 = vld [vmem:[%s3067_s30 + $0xd18] sm:$0xff]  ;;  %2085 = vst [vmem:[%s3082_s17 + $0xcd8] sm:$0xff] %v2695_v57  ;;  %v2701_v5 = vclamps-f32 %v555_v2, 1.0 }
 0x106   : > { %2086 = vst [vmem:[%s3082_s17 + $0xce0] sm:$0xff] %v2696_v58  ;;  %2087 = vst [vmem:[%s3082_s17 + $0xce8] sm:$0xff] %v2697_v59  ;;  %v2702_v6 = vclamps-f32 %v556_v3, 1.0  ;;  %v2703_v7 = vclamps-f32 %v557_v4, 1.0  ;;  %v558_v8 = vld [vmem:[%s3067_s30 + $0xd20] sm:$0xff]  ;;  %v559_v9 = vld [vmem:[%s3067_s30 + $0xd28] sm:$0xff] }
 0x107   : > { %v560_v10 = vld [vmem:[%s3067_s30 + $0xd30] sm:$0xff]  ;;  %2088 = vst [vmem:[%s3082_s17 + $0xcf0] sm:$0xff] %v2698_v63  ;;  %2089 = vst [vmem:[%s3082_s17 + $0xcf8] sm:$0xff] %v2699_v0  ;;  %v2704_v11 = vclamps-f32 %v558_v8, 1.0  ;;  %v2705_v12 = vclamps-f32 %v559_v9, 1.0  ;;  %v561_v14 = vld [vmem:[%s3067_s30 + $0xd38] sm:$0xff] }
 0x108   : > { %2090 = vst [vmem:[%s3082_s17 + $0xd00] sm:$0xff] %v2700_v1  ;;  %v2706_v13 = vclamps-f32 %v560_v10, 1.0  ;;  %v562_v15 = vld [vmem:[%s3067_s30 + $0xd40] sm:$0xff]  ;;  %v563_v16 = vld [vmem:[%s3067_s30 + $0xd48] sm:$0xff]  ;;  %2091 = vst [vmem:[%s3082_s17 + $0xd08] sm:$0xff] %v2701_v5  ;;  %v2707_v17 = vclamps-f32 %v561_v14, 1.0 }
 0x109   : > { %2092 = vst [vmem:[%s3082_s17 + $0xd10] sm:$0xff] %v2702_v6  ;;  %2093 = vst [vmem:[%s3082_s17 + $0xd18] sm:$0xff] %v2703_v7  ;;  %v2708_v18 = vclamps-f32 %v562_v15, 1.0  ;;  %v2709_v19 = vclamps-f32 %v563_v16, 1.0  ;;  %v564_v20 = vld [vmem:[%s3067_s30 + $0xd50] sm:$0xff]  ;;  %v565_v21 = vld [vmem:[%s3067_s30 + $0xd58] sm:$0xff] }
 0x10a   : > { %v566_v22 = vld [vmem:[%s3067_s30 + $0xd60] sm:$0xff]  ;;  %2094 = vst [vmem:[%s3082_s17 + $0xd20] sm:$0xff] %v2704_v11  ;;  %2095 = vst [vmem:[%s3082_s17 + $0xd28] sm:$0xff] %v2705_v12  ;;  %v2710_v23 = vclamps-f32 %v564_v20, 1.0  ;;  %v2711_v24 = vclamps-f32 %v565_v21, 1.0  ;;  %v567_v26 = vld [vmem:[%s3067_s30 + $0xd68] sm:$0xff] }
 0x10b   : > { %2096 = vst [vmem:[%s3082_s17 + $0xd30] sm:$0xff] %v2706_v13  ;;  %v2712_v25 = vclamps-f32 %v566_v22, 1.0  ;;  %v568_v27 = vld [vmem:[%s3067_s30 + $0xd70] sm:$0xff]  ;;  %v569_v28 = vld [vmem:[%s3067_s30 + $0xd78] sm:$0xff]  ;;  %2097 = vst [vmem:[%s3082_s17 + $0xd38] sm:$0xff] %v2707_v17  ;;  %v2713_v29 = vclamps-f32 %v567_v26, 1.0 }
 0x10c   : > { %2098 = vst [vmem:[%s3082_s17 + $0xd40] sm:$0xff] %v2708_v18  ;;  %2099 = vst [vmem:[%s3082_s17 + $0xd48] sm:$0xff] %v2709_v19  ;;  %v2714_v30 = vclamps-f32 %v568_v27, 1.0  ;;  %v2715_v31 = vclamps-f32 %v569_v28, 1.0  ;;  %v570_v32 = vld [vmem:[%s3067_s30 + $0xd80] sm:$0xff]  ;;  %v571_v33 = vld [vmem:[%s3067_s30 + $0xd88] sm:$0xff] }
 0x10d   : > { %v572_v34 = vld [vmem:[%s3067_s30 + $0xd90] sm:$0xff]  ;;  %2100 = vst [vmem:[%s3082_s17 + $0xd50] sm:$0xff] %v2710_v23  ;;  %2101 = vst [vmem:[%s3082_s17 + $0xd58] sm:$0xff] %v2711_v24  ;;  %v2716_v35 = vclamps-f32 %v570_v32, 1.0  ;;  %v2717_v36 = vclamps-f32 %v571_v33, 1.0  ;;  %v573_v38 = vld [vmem:[%s3067_s30 + $0xd98] sm:$0xff] }
 0x10e   : > { %2102 = vst [vmem:[%s3082_s17 + $0xd60] sm:$0xff] %v2712_v25  ;;  %v2718_v37 = vclamps-f32 %v572_v34, 1.0  ;;  %v574_v39 = vld [vmem:[%s3067_s30 + $0xda0] sm:$0xff]  ;;  %v575_v40 = vld [vmem:[%s3067_s30 + $0xda8] sm:$0xff]  ;;  %2103 = vst [vmem:[%s3082_s17 + $0xd68] sm:$0xff] %v2713_v29  ;;  %v2719_v41 = vclamps-f32 %v573_v38, 1.0 }
 0x10f   : > { %2104 = vst [vmem:[%s3082_s17 + $0xd70] sm:$0xff] %v2714_v30  ;;  %2105 = vst [vmem:[%s3082_s17 + $0xd78] sm:$0xff] %v2715_v31  ;;  %v2720_v42 = vclamps-f32 %v574_v39, 1.0  ;;  %v2721_v43 = vclamps-f32 %v575_v40, 1.0  ;;  %v576_v44 = vld [vmem:[%s3067_s30 + $0xdb0] sm:$0xff]  ;;  %v577_v45 = vld [vmem:[%s3067_s30 + $0xdb8] sm:$0xff] }
 0x110   : > { %v578_v46 = vld [vmem:[%s3067_s30 + $0xdc0] sm:$0xff]  ;;  %2106 = vst [vmem:[%s3082_s17 + $0xd80] sm:$0xff] %v2716_v35  ;;  %2107 = vst [vmem:[%s3082_s17 + $0xd88] sm:$0xff] %v2717_v36  ;;  %v2722_v47 = vclamps-f32 %v576_v44, 1.0  ;;  %v2723_v48 = vclamps-f32 %v577_v45, 1.0  ;;  %v579_v50 = vld [vmem:[%s3067_s30 + $0xdc8] sm:$0xff] }
 0x111   : > { %2108 = vst [vmem:[%s3082_s17 + $0xd90] sm:$0xff] %v2718_v37  ;;  %v2724_v49 = vclamps-f32 %v578_v46, 1.0  ;;  %v580_v51 = vld [vmem:[%s3067_s30 + $0xdd0] sm:$0xff]  ;;  %v581_v52 = vld [vmem:[%s3067_s30 + $0xdd8] sm:$0xff]  ;;  %2109 = vst [vmem:[%s3082_s17 + $0xd98] sm:$0xff] %v2719_v41  ;;  %v2725_v53 = vclamps-f32 %v579_v50, 1.0 }
 0x112   : > { %2110 = vst [vmem:[%s3082_s17 + $0xda0] sm:$0xff] %v2720_v42  ;;  %2111 = vst [vmem:[%s3082_s17 + $0xda8] sm:$0xff] %v2721_v43  ;;  %v2726_v54 = vclamps-f32 %v580_v51, 1.0  ;;  %v2727_v55 = vclamps-f32 %v581_v52, 1.0  ;;  %v582_v56 = vld [vmem:[%s3067_s30 + $0xde0] sm:$0xff]  ;;  %v583_v57 = vld [vmem:[%s3067_s30 + $0xde8] sm:$0xff] }
 0x113   : > { %v584_v58 = vld [vmem:[%s3067_s30 + $0xdf0] sm:$0xff]  ;;  %2112 = vst [vmem:[%s3082_s17 + $0xdb0] sm:$0xff] %v2722_v47  ;;  %2113 = vst [vmem:[%s3082_s17 + $0xdb8] sm:$0xff] %v2723_v48  ;;  %v2728_v59 = vclamps-f32 %v582_v56, 1.0  ;;  %v2729_v60 = vclamps-f32 %v583_v57, 1.0  ;;  %v585_v62 = vld [vmem:[%s3067_s30 + $0xdf8] sm:$0xff] }
 0x114   : > { %2114 = vst [vmem:[%s3082_s17 + $0xdc0] sm:$0xff] %v2724_v49  ;;  %v2730_v61 = vclamps-f32 %v584_v58, 1.0  ;;  %v586_v63 = vld [vmem:[%s3067_s30 + $0xe00] sm:$0xff]  ;;  %v587_v0 = vld [vmem:[%s3067_s30 + $0xe08] sm:$0xff]  ;;  %2115 = vst [vmem:[%s3082_s17 + $0xdc8] sm:$0xff] %v2725_v53  ;;  %v2731_v1 = vclamps-f32 %v585_v62, 1.0 }
 0x115   : > { %2116 = vst [vmem:[%s3082_s17 + $0xdd0] sm:$0xff] %v2726_v54  ;;  %2117 = vst [vmem:[%s3082_s17 + $0xdd8] sm:$0xff] %v2727_v55  ;;  %v2732_v2 = vclamps-f32 %v586_v63, 1.0  ;;  %v2733_v3 = vclamps-f32 %v587_v0, 1.0  ;;  %v588_v4 = vld [vmem:[%s3067_s30 + $0xe10] sm:$0xff]  ;;  %v589_v5 = vld [vmem:[%s3067_s30 + $0xe18] sm:$0xff] }
 0x116   : > { %v590_v6 = vld [vmem:[%s3067_s30 + $0xe20] sm:$0xff]  ;;  %2118 = vst [vmem:[%s3082_s17 + $0xde0] sm:$0xff] %v2728_v59  ;;  %2119 = vst [vmem:[%s3082_s17 + $0xde8] sm:$0xff] %v2729_v60  ;;  %v2734_v7 = vclamps-f32 %v588_v4, 1.0  ;;  %v2735_v8 = vclamps-f32 %v589_v5, 1.0  ;;  %v591_v10 = vld [vmem:[%s3067_s30 + $0xe28] sm:$0xff] }
 0x117   : > { %2120 = vst [vmem:[%s3082_s17 + $0xdf0] sm:$0xff] %v2730_v61  ;;  %v2736_v9 = vclamps-f32 %v590_v6, 1.0  ;;  %v592_v11 = vld [vmem:[%s3067_s30 + $0xe30] sm:$0xff]  ;;  %v593_v12 = vld [vmem:[%s3067_s30 + $0xe38] sm:$0xff]  ;;  %2121 = vst [vmem:[%s3082_s17 + $0xdf8] sm:$0xff] %v2731_v1  ;;  %v2737_v13 = vclamps-f32 %v591_v10, 1.0 }
 0x118   : > { %2122 = vst [vmem:[%s3082_s17 + $0xe00] sm:$0xff] %v2732_v2  ;;  %2123 = vst [vmem:[%s3082_s17 + $0xe08] sm:$0xff] %v2733_v3  ;;  %v2738_v14 = vclamps-f32 %v592_v11, 1.0  ;;  %v2739_v15 = vclamps-f32 %v593_v12, 1.0  ;;  %v594_v16 = vld [vmem:[%s3067_s30 + $0xe40] sm:$0xff]  ;;  %v595_v17 = vld [vmem:[%s3067_s30 + $0xe48] sm:$0xff] }
 0x119   : > { %v596_v18 = vld [vmem:[%s3067_s30 + $0xe50] sm:$0xff]  ;;  %2124 = vst [vmem:[%s3082_s17 + $0xe10] sm:$0xff] %v2734_v7  ;;  %2125 = vst [vmem:[%s3082_s17 + $0xe18] sm:$0xff] %v2735_v8  ;;  %v2740_v19 = vclamps-f32 %v594_v16, 1.0  ;;  %v2741_v20 = vclamps-f32 %v595_v17, 1.0  ;;  %v597_v22 = vld [vmem:[%s3067_s30 + $0xe58] sm:$0xff] }
 0x11a   : > { %2126 = vst [vmem:[%s3082_s17 + $0xe20] sm:$0xff] %v2736_v9  ;;  %v2742_v21 = vclamps-f32 %v596_v18, 1.0  ;;  %v598_v23 = vld [vmem:[%s3067_s30 + $0xe60] sm:$0xff]  ;;  %v599_v24 = vld [vmem:[%s3067_s30 + $0xe68] sm:$0xff]  ;;  %2127 = vst [vmem:[%s3082_s17 + $0xe28] sm:$0xff] %v2737_v13  ;;  %v2743_v25 = vclamps-f32 %v597_v22, 1.0 }
 0x11b   : > { %2128 = vst [vmem:[%s3082_s17 + $0xe30] sm:$0xff] %v2738_v14  ;;  %2129 = vst [vmem:[%s3082_s17 + $0xe38] sm:$0xff] %v2739_v15  ;;  %v2744_v26 = vclamps-f32 %v598_v23, 1.0  ;;  %v2745_v27 = vclamps-f32 %v599_v24, 1.0  ;;  %v600_v28 = vld [vmem:[%s3067_s30 + $0xe70] sm:$0xff]  ;;  %v601_v29 = vld [vmem:[%s3067_s30 + $0xe78] sm:$0xff] }
 0x11c   : > { %v602_v30 = vld [vmem:[%s3067_s30 + $0xe80] sm:$0xff]  ;;  %2130 = vst [vmem:[%s3082_s17 + $0xe40] sm:$0xff] %v2740_v19  ;;  %2131 = vst [vmem:[%s3082_s17 + $0xe48] sm:$0xff] %v2741_v20  ;;  %v2746_v31 = vclamps-f32 %v600_v28, 1.0  ;;  %v2747_v32 = vclamps-f32 %v601_v29, 1.0  ;;  %v603_v34 = vld [vmem:[%s3067_s30 + $0xe88] sm:$0xff] }
 0x11d   : > { %2132 = vst [vmem:[%s3082_s17 + $0xe50] sm:$0xff] %v2742_v21  ;;  %v2748_v33 = vclamps-f32 %v602_v30, 1.0  ;;  %v604_v35 = vld [vmem:[%s3067_s30 + $0xe90] sm:$0xff]  ;;  %v605_v36 = vld [vmem:[%s3067_s30 + $0xe98] sm:$0xff]  ;;  %2133 = vst [vmem:[%s3082_s17 + $0xe58] sm:$0xff] %v2743_v25  ;;  %v2749_v37 = vclamps-f32 %v603_v34, 1.0 }
 0x11e   : > { %2134 = vst [vmem:[%s3082_s17 + $0xe60] sm:$0xff] %v2744_v26  ;;  %2135 = vst [vmem:[%s3082_s17 + $0xe68] sm:$0xff] %v2745_v27  ;;  %v2750_v38 = vclamps-f32 %v604_v35, 1.0  ;;  %v2751_v39 = vclamps-f32 %v605_v36, 1.0  ;;  %v606_v40 = vld [vmem:[%s3067_s30 + $0xea0] sm:$0xff]  ;;  %v607_v41 = vld [vmem:[%s3067_s30 + $0xea8] sm:$0xff] }
 0x11f   : > { %v608_v42 = vld [vmem:[%s3067_s30 + $0xeb0] sm:$0xff]  ;;  %2136 = vst [vmem:[%s3082_s17 + $0xe70] sm:$0xff] %v2746_v31  ;;  %2137 = vst [vmem:[%s3082_s17 + $0xe78] sm:$0xff] %v2747_v32  ;;  %v2752_v43 = vclamps-f32 %v606_v40, 1.0  ;;  %v2753_v44 = vclamps-f32 %v607_v41, 1.0  ;;  %v609_v46 = vld [vmem:[%s3067_s30 + $0xeb8] sm:$0xff] }
 0x120   : > { %2138 = vst [vmem:[%s3082_s17 + $0xe80] sm:$0xff] %v2748_v33  ;;  %v2754_v45 = vclamps-f32 %v608_v42, 1.0  ;;  %v610_v47 = vld [vmem:[%s3067_s30 + $0xec0] sm:$0xff]  ;;  %v611_v48 = vld [vmem:[%s3067_s30 + $0xec8] sm:$0xff]  ;;  %2139 = vst [vmem:[%s3082_s17 + $0xe88] sm:$0xff] %v2749_v37  ;;  %v2755_v49 = vclamps-f32 %v609_v46, 1.0 }
 0x121   : > { %2140 = vst [vmem:[%s3082_s17 + $0xe90] sm:$0xff] %v2750_v38  ;;  %2141 = vst [vmem:[%s3082_s17 + $0xe98] sm:$0xff] %v2751_v39  ;;  %v2756_v50 = vclamps-f32 %v610_v47, 1.0  ;;  %v2757_v51 = vclamps-f32 %v611_v48, 1.0  ;;  %v612_v52 = vld [vmem:[%s3067_s30 + $0xed0] sm:$0xff]  ;;  %v613_v53 = vld [vmem:[%s3067_s30 + $0xed8] sm:$0xff] }
 0x122   : > { %v614_v54 = vld [vmem:[%s3067_s30 + $0xee0] sm:$0xff]  ;;  %2142 = vst [vmem:[%s3082_s17 + $0xea0] sm:$0xff] %v2752_v43  ;;  %2143 = vst [vmem:[%s3082_s17 + $0xea8] sm:$0xff] %v2753_v44  ;;  %v2758_v55 = vclamps-f32 %v612_v52, 1.0  ;;  %v2759_v56 = vclamps-f32 %v613_v53, 1.0  ;;  %v615_v58 = vld [vmem:[%s3067_s30 + $0xee8] sm:$0xff] }
 0x123   : > { %2144 = vst [vmem:[%s3082_s17 + $0xeb0] sm:$0xff] %v2754_v45  ;;  %v2760_v57 = vclamps-f32 %v614_v54, 1.0  ;;  %v616_v59 = vld [vmem:[%s3067_s30 + $0xef0] sm:$0xff]  ;;  %v617_v60 = vld [vmem:[%s3067_s30 + $0xef8] sm:$0xff]  ;;  %2145 = vst [vmem:[%s3082_s17 + $0xeb8] sm:$0xff] %v2755_v49  ;;  %v2761_v61 = vclamps-f32 %v615_v58, 1.0 }
 0x124   : > { %2146 = vst [vmem:[%s3082_s17 + $0xec0] sm:$0xff] %v2756_v50  ;;  %2147 = vst [vmem:[%s3082_s17 + $0xec8] sm:$0xff] %v2757_v51  ;;  %v2762_v62 = vclamps-f32 %v616_v59, 1.0  ;;  %v2763_v63 = vclamps-f32 %v617_v60, 1.0  ;;  %v618_v0 = vld [vmem:[%s3067_s30 + $0xf00] sm:$0xff]  ;;  %v619_v1 = vld [vmem:[%s3067_s30 + $0xf08] sm:$0xff] }
 0x125   : > { %v620_v2 = vld [vmem:[%s3067_s30 + $0xf10] sm:$0xff]  ;;  %2148 = vst [vmem:[%s3082_s17 + $0xed0] sm:$0xff] %v2758_v55  ;;  %2149 = vst [vmem:[%s3082_s17 + $0xed8] sm:$0xff] %v2759_v56  ;;  %v2764_v3 = vclamps-f32 %v618_v0, 1.0  ;;  %v2765_v4 = vclamps-f32 %v619_v1, 1.0  ;;  %v621_v6 = vld [vmem:[%s3067_s30 + $0xf18] sm:$0xff] }
 0x126   : > { %2150 = vst [vmem:[%s3082_s17 + $0xee0] sm:$0xff] %v2760_v57  ;;  %v2766_v5 = vclamps-f32 %v620_v2, 1.0  ;;  %v622_v7 = vld [vmem:[%s3067_s30 + $0xf20] sm:$0xff]  ;;  %v623_v8 = vld [vmem:[%s3067_s30 + $0xf28] sm:$0xff]  ;;  %2151 = vst [vmem:[%s3082_s17 + $0xee8] sm:$0xff] %v2761_v61  ;;  %v2767_v9 = vclamps-f32 %v621_v6, 1.0 }
 0x127   : > { %2152 = vst [vmem:[%s3082_s17 + $0xef0] sm:$0xff] %v2762_v62  ;;  %2153 = vst [vmem:[%s3082_s17 + $0xef8] sm:$0xff] %v2763_v63  ;;  %v2768_v10 = vclamps-f32 %v622_v7, 1.0  ;;  %v2769_v11 = vclamps-f32 %v623_v8, 1.0  ;;  %v624_v12 = vld [vmem:[%s3067_s30 + $0xf30] sm:$0xff]  ;;  %v625_v13 = vld [vmem:[%s3067_s30 + $0xf38] sm:$0xff] }
 0x128   : > { %v626_v14 = vld [vmem:[%s3067_s30 + $0xf40] sm:$0xff]  ;;  %2154 = vst [vmem:[%s3082_s17 + $0xf00] sm:$0xff] %v2764_v3  ;;  %2155 = vst [vmem:[%s3082_s17 + $0xf08] sm:$0xff] %v2765_v4  ;;  %v2770_v15 = vclamps-f32 %v624_v12, 1.0  ;;  %v2771_v16 = vclamps-f32 %v625_v13, 1.0  ;;  %v627_v18 = vld [vmem:[%s3067_s30 + $0xf48] sm:$0xff] }
 0x129   : > { %2156 = vst [vmem:[%s3082_s17 + $0xf10] sm:$0xff] %v2766_v5  ;;  %v2772_v17 = vclamps-f32 %v626_v14, 1.0  ;;  %v628_v19 = vld [vmem:[%s3067_s30 + $0xf50] sm:$0xff]  ;;  %v629_v20 = vld [vmem:[%s3067_s30 + $0xf58] sm:$0xff]  ;;  %2157 = vst [vmem:[%s3082_s17 + $0xf18] sm:$0xff] %v2767_v9  ;;  %v2773_v21 = vclamps-f32 %v627_v18, 1.0 }
 0x12a   : > { %2158 = vst [vmem:[%s3082_s17 + $0xf20] sm:$0xff] %v2768_v10  ;;  %2159 = vst [vmem:[%s3082_s17 + $0xf28] sm:$0xff] %v2769_v11  ;;  %v2774_v22 = vclamps-f32 %v628_v19, 1.0  ;;  %v2775_v23 = vclamps-f32 %v629_v20, 1.0  ;;  %v630_v24 = vld [vmem:[%s3067_s30 + $0xf60] sm:$0xff]  ;;  %v631_v25 = vld [vmem:[%s3067_s30 + $0xf68] sm:$0xff] }
 0x12b   : > { %v632_v26 = vld [vmem:[%s3067_s30 + $0xf70] sm:$0xff]  ;;  %2160 = vst [vmem:[%s3082_s17 + $0xf30] sm:$0xff] %v2770_v15  ;;  %2161 = vst [vmem:[%s3082_s17 + $0xf38] sm:$0xff] %v2771_v16  ;;  %v2776_v27 = vclamps-f32 %v630_v24, 1.0  ;;  %v2777_v28 = vclamps-f32 %v631_v25, 1.0  ;;  %v633_v30 = vld [vmem:[%s3067_s30 + $0xf78] sm:$0xff] }
 0x12c   : > { %2162 = vst [vmem:[%s3082_s17 + $0xf40] sm:$0xff] %v2772_v17  ;;  %v2778_v29 = vclamps-f32 %v632_v26, 1.0  ;;  %v634_v31 = vld [vmem:[%s3067_s30 + $0xf80] sm:$0xff]  ;;  %v635_v32 = vld [vmem:[%s3067_s30 + $0xf88] sm:$0xff]  ;;  %2163 = vst [vmem:[%s3082_s17 + $0xf48] sm:$0xff] %v2773_v21  ;;  %v2779_v33 = vclamps-f32 %v633_v30, 1.0 }
 0x12d   : > { %2164 = vst [vmem:[%s3082_s17 + $0xf50] sm:$0xff] %v2774_v22  ;;  %2165 = vst [vmem:[%s3082_s17 + $0xf58] sm:$0xff] %v2775_v23  ;;  %v2780_v34 = vclamps-f32 %v634_v31, 1.0  ;;  %v2781_v35 = vclamps-f32 %v635_v32, 1.0  ;;  %v636_v36 = vld [vmem:[%s3067_s30 + $0xf90] sm:$0xff]  ;;  %v637_v37 = vld [vmem:[%s3067_s30 + $0xf98] sm:$0xff] }
 0x12e   : > { %v638_v38 = vld [vmem:[%s3067_s30 + $0xfa0] sm:$0xff]  ;;  %2166 = vst [vmem:[%s3082_s17 + $0xf60] sm:$0xff] %v2776_v27  ;;  %2167 = vst [vmem:[%s3082_s17 + $0xf68] sm:$0xff] %v2777_v28  ;;  %v2782_v39 = vclamps-f32 %v636_v36, 1.0  ;;  %v2783_v40 = vclamps-f32 %v637_v37, 1.0  ;;  %v639_v42 = vld [vmem:[%s3067_s30 + $0xfa8] sm:$0xff] }
 0x12f   : > { %2168 = vst [vmem:[%s3082_s17 + $0xf70] sm:$0xff] %v2778_v29  ;;  %v2784_v41 = vclamps-f32 %v638_v38, 1.0  ;;  %v640_v43 = vld [vmem:[%s3067_s30 + $0xfb0] sm:$0xff]  ;;  %v641_v44 = vld [vmem:[%s3067_s30 + $0xfb8] sm:$0xff]  ;;  %2169 = vst [vmem:[%s3082_s17 + $0xf78] sm:$0xff] %v2779_v33  ;;  %v2785_v45 = vclamps-f32 %v639_v42, 1.0 }
 0x130   : > { %2170 = vst [vmem:[%s3082_s17 + $0xf80] sm:$0xff] %v2780_v34  ;;  %2171 = vst [vmem:[%s3082_s17 + $0xf88] sm:$0xff] %v2781_v35  ;;  %v2786_v46 = vclamps-f32 %v640_v43, 1.0  ;;  %v2787_v47 = vclamps-f32 %v641_v44, 1.0  ;;  %v642_v48 = vld [vmem:[%s3067_s30 + $0xfc0] sm:$0xff]  ;;  %v643_v49 = vld [vmem:[%s3067_s30 + $0xfc8] sm:$0xff] }
 0x131   : > { %v644_v50 = vld [vmem:[%s3067_s30 + $0xfd0] sm:$0xff]  ;;  %2172 = vst [vmem:[%s3082_s17 + $0xf90] sm:$0xff] %v2782_v39  ;;  %2173 = vst [vmem:[%s3082_s17 + $0xf98] sm:$0xff] %v2783_v40  ;;  %v2788_v51 = vclamps-f32 %v642_v48, 1.0  ;;  %v2789_v52 = vclamps-f32 %v643_v49, 1.0  ;;  %v645_v54 = vld [vmem:[%s3067_s30 + $0xfd8] sm:$0xff] }
 0x132   : > { %2174 = vst [vmem:[%s3082_s17 + $0xfa0] sm:$0xff] %v2784_v41  ;;  %v2790_v53 = vclamps-f32 %v644_v50, 1.0  ;;  %v646_v55 = vld [vmem:[%s3067_s30 + $0xfe0] sm:$0xff]  ;;  %v647_v56 = vld [vmem:[%s3067_s30 + $0xfe8] sm:$0xff]  ;;  %2175 = vst [vmem:[%s3082_s17 + $0xfa8] sm:$0xff] %v2785_v45  ;;  %v2791_v57 = vclamps-f32 %v645_v54, 1.0 }
 0x133   : > { %2176 = vst [vmem:[%s3082_s17 + $0xfb0] sm:$0xff] %v2786_v46  ;;  %2177 = vst [vmem:[%s3082_s17 + $0xfb8] sm:$0xff] %v2787_v47  ;;  %v2792_v58 = vclamps-f32 %v646_v55, 1.0  ;;  %v2793_v59 = vclamps-f32 %v647_v56, 1.0  ;;  %v648_v60 = vld [vmem:[%s3067_s30 + $0xff0] sm:$0xff]  ;;  %v649_v61 = vld [vmem:[%s3067_s30 + $0xff8] sm:$0xff] }
 0x134   : > { %2178 = vst [vmem:[%s3082_s17 + $0xfc0] sm:$0xff] %v2788_v51  ;;  %2179 = vst [vmem:[%s3082_s17 + $0xfc8] sm:$0xff] %v2789_v52  ;;  %v2794_v62 = vclamps-f32 %v648_v60, 1.0  ;;  %v2795_v63 = vclamps-f32 %v649_v61, 1.0  ;;  %s2187_s3 = scalar_lea.sflag [#allocation4], %s3063_s23  ;;  %s2884_s4 = scalar_lea.vmem %s4104_s27, 65536 }
 0x135   : > { %2180 = vst [vmem:[%s3082_s17 + $0xfd0] sm:$0xff] %v2790_v53  ;;  %2181 = vst [vmem:[%s3082_s17 + $0xfd8] sm:$0xff] %v2791_v57  ;;  %p2885_p11 = scmp.ne.s32.totalorder %s4104_s27, %s2884_s4  ;;  %p4159_p12 = scmp.ne.s32.totalorder %s4155_s18, 0 }
 0x136   : > { %2182 = vst [vmem:[%s3082_s17 + $0xfe0] sm:$0xff] %v2792_v58  ;;  %2183 = vst [vmem:[%s3082_s17 + $0xfe8] sm:$0xff] %v2793_v59  ;;  %s2953_s10 = smov [#allocation5]  }
 0x137   : > { %2184 = vst [vmem:[%s3082_s17 + $0xff0] sm:$0xff] %v2794_v62  ;;  %2185 = vst [vmem:[%s3082_s17 + $0xff8] sm:$0xff] %v2795_v63  ;;  %p2886_p13 = pnand %p2885_p11, %p4159_p12  ;;  %s2888_s5 = sshll.u32 %s2953_s10, 4  ;;  %s2889_s5 = int_to_ptr.vmem [resolvable:$false] %s2888_s5 }
 0x138   : > { %s2890_s11 = scalar_lea.vmem %s2889_s5, 131072  ;;  %p2891_p5 = scmp.lt.s32.totalorder %s4104_s27, %s2889_s5 }
 0x139   : > { %p2887_p4 = pneg %p2886_p13  ;;  %p2892_p7 = scmp.lt.s32.totalorder %s2890_s11, %s2884_s4 }
 0x13b   : > { %p2893_p8 = por %p2892_p7, %p2891_p5 }
 0x13d   : > { %p2894_p10 = pnand %p2893_p8, %p2887_p4 }
 0x13f   : > { %2897 = shalt.err (!%p2894_p10)
}
 0x140   : > { %s2898_s13 = scalar_lea.hbm %s4102_s2, 65536  ;;  %s2902_s20 = scalar_lea.hbm %s4150_s1, 131072 }
 0x141   : > { %p2899_p0 = scmp.ne.s32.totalorder %s4102_s2, %s2898_s13  ;;  %p2903_p1 = scmp.lt.s32.totalorder %s4102_s2, %s4150_s1 }
 0x142   : > { %p2904_p3 = scmp.lt.s32.totalorder %s2902_s20, %s2898_s13 }
 0x143   : > { %p2900_p2 = pnand %p2899_p0, %p4159_p12 }
 0x144   : > { %p2905_p6 = por %p2904_p3, %p2903_p1 }
 0x145   : > { %p2901_p9 = pneg %p2900_p2 }
 0x147   : > { %p2906_p11 = pnand %p2905_p6, %p2901_p9 }
 0x149   : > { %2909 = shalt.err (!%p2906_p11)
}
 0x14a   : > { %s2954_s24 = smov 1024   ;;  %s2955_s26 = smov 64  }
 0x14b   : > { %2808 = dma.vmem_to_hbm [thread:$0]  (%p4159_p12), %s4104_s27, 65536, %s4102_s2, %s2187_s3, %s2954_s24, %s2954_s24, %s2955_s26  }
 0x14c PF: > { %s2216_s30 = sand.u32 1, %s2936_s6   ;;  %p4160_p13 = scmp.ne.s32.totalorder %s4156_s19, 0 }
 0x14d   : > { %p4161_p4 = scmp.ge.s32.totalorder %s2948_s9, 2  ;;  %s2217_s17 = scalar_lea.sflag [#allocation4], %s2216_s30 }
 0x14f   : > { %p2815_p5 = pnand %p4161_p4, %p4160_p13 }
 0x151   : > { %p2816_p7 = pneg %p2815_p5 }
 0x153   : > { %2931 = dma.done.wait (%p2816_p7), %s2217_s17, 65536  }
 0x154   : > { %2933 = vsyncadd (%p2816_p7), %s2217_s17, 4294901760  ;;  %p14_p8 = scmp.ge.s32.totalorder %s2991_s12, 4   ;;  %s4162_s6 = smov %s2940_s7 }
 0x155   : > { %s4163_s7 = smov %s2944_s8  ;;  %s4164_s8 = smov %s3003_s15 }
 0x156   : > { %s4165_s9 = smov %s2991_s12  ;;  %16 = sbr.rel (!%p14_p8) target bundleno = 5 (0x5), region = 69 }
 0x15b   :  { %2222 = vsyncpa [#allocation3], 1 }
 0x15c   :  { %2224 = vsyncpa [#allocation3 + $0x1], 1 }
 0x15d   :  { %2225 = vsyncpa [#allocation4], 1 }
 0x15e   :  { %2227 = vsyncpa [#allocation4 + $0x1], 1 }

</bundles_post_ra>
